<compile_context>
chip_gen: v7x
topology: tpu7x:2x2x1
jax: 0.10.0
libtpu: 0.0.40
codegen_flags: <defaults>
</compile_context>

<pallas_src>
import functools

import jax
import jax.numpy as jnp
from jax.experimental import pallas as pl
from jax.experimental.pallas import tpu as pltpu


# ----------------------------- chip-aware knobs -------------------------------

@functools.lru_cache(maxsize=None)
def _device_kind():
    try:
        return jax.devices()[0].device_kind.lower()
    except Exception:
        return ""


@functools.lru_cache(maxsize=None)
def _vmem_limit():
    """Scoped-VMEM limit: ~3/4 of physical, never above 48 MiB on v7x."""
    kind = _device_kind()
    phys = None
    try:
        info = pltpu.get_tpu_info()
        for name in ("vmem_capacity_bytes", "vmem_size_bytes", "vmem_bytes"):
            v = getattr(info, name, None)
            if v:
                phys = int(v)
                break
    except Exception:
        phys = None
    if phys:
        limit = min(100 * 1024 * 1024, (phys * 3) // 4)
    elif ("v5" in kind) or ("v6" in kind):
        limit = 96 * 1024 * 1024          # 128 MiB physical -> leave headroom
    else:
        limit = 48 * 1024 * 1024          # v7x (64 MiB / TC) or unknown
    if "v7" in kind:
        limit = min(limit, 48 * 1024 * 1024)
    return int(limit)


def _pick_tile(size, targets):
    """Largest target tile evenly dividing `size`; else the full dimension."""
    for t in targets:
        if size >= t and size % t == 0:
            return t
    return size


def _choose_chunk(n, override=None):
    """Return (chunk, padded_n).  Chip-aware: prefer 128 on v5e, else 256."""
    if override is not None:
        c = int(override)
        return c, ((n + c - 1) // c) * c
    prefer_small = "v5" in _device_kind()           # 4x128 MXU, weaker VPU/EUP
    cands = (128, 256, 64, 32, 16, 8) if prefer_small else (256, 128, 64, 32, 16, 8)
    for c in cands:
        if n >= c and n % c == 0:
            return c, n
    # no clean divisor: pad the sequence instead of a full-sequence chunk
    c = 128 if n > 128 else ((n + 7) // 8) * 8
    return c, ((n + c - 1) // c) * c


def _pick_head_block(bh, chunk):
    """Heads processed per gate-loop grid step (amortizes per-step overhead)."""
    hb = 1
    for cand in (8, 4, 2):
        if bh % cand == 0:
            hb = cand
            break
    # keep the (hb, C, C) f32 temporaries comfortably inside the VMEM budget
    while hb > 1 and hb * chunk * chunk * 4 * 6 > _vmem_limit() // 2:
        hb //= 2
    return hb


# ------------------------------ Pallas kernels --------------------------------

def _matmul_kernel(x_ref, w_ref, o_ref, acc_ref):
    """Tiled matmul with f32 accumulator; reduction axis is grid axis 2."""
    @pl.when(pl.program_id(2) == 0)
    def _():
        acc_ref[...] = jnp.zeros_like(acc_ref)

    acc_ref[...] += jnp.dot(x_ref[...], w_ref[...],
                            preferred_element_type=jnp.float32)

    @pl.when(pl.program_id(2) == pl.num_programs(2) - 1)
    def _():
        o_ref[...] = acc_ref[...].astype(o_ref.dtype)


def _silu_gate_matmul_kernel(x_ref, w_ref, attn_ref, o_ref, acc_ref):
    """h = silu(x @ Wg) * attn, fully tiled (reduction on grid axis 2)."""
    @pl.when(pl.program_id(2) == 0)
    def _():
        acc_ref[...] = jnp.zeros_like(acc_ref)

    acc_ref[...] += jnp.dot(x_ref[...], w_ref[...],
                            preferred_element_type=jnp.float32)

    @pl.when(pl.program_id(2) == pl.num_programs(2) - 1)
    def _():
        gates = acc_ref[...]
        gates = gates * jax.nn.sigmoid(gates)                  # SiLU in f32
        o_ref[...] = (gates * attn_ref[...].astype(jnp.float32)).astype(o_ref.dtype)


def _gateloop_kernel(q_ref, k_ref, v_ref, lcc_ref, scc_ref, lcr_ref, scr_ref,
                     o_ref, kv_state, mask_s):
    """Chunked gated linear attention over a block of `hb` heads.

    q/k/v/o: (hb, C, d) compute dtype.
    lcc/scc: (hb, C, 1) f32 per-chunk inclusive cumulative log|g| / parity sign.
    lcr/scr: (hb, 1, C) f32 same data, lane-dense layout.
    kv_state: (hb, d, d) f32 scratch carried across the sequence-chunk axis.
    mask_s:  (C, C) f32 causal mask built once per head-block.
    """
    c_idx = pl.program_id(1)
    C = q_ref.shape[1]

    @pl.when(c_idx == 0)
    def _():
        kv_state[...] = jnp.zeros_like(kv_state)
        row = jax.lax.broadcasted_iota(jnp.int32, (C, C), 0)   # query index t
        col = jax.lax.broadcasted_iota(jnp.int32, (C, C), 1)   # key index i
        mask_s[...] = (col <= row).astype(jnp.float32)

    q = q_ref[...]
    k = k_ref[...]
    v = v_ref[...]
    cdt = q.dtype

    lc_c = lcc_ref[...]            # (hb, C, 1)
    sc_c = scc_ref[...]            # (hb, C, 1)
    lc_r = lcr_ref[...]            # (hb, 1, C)
    sc_r = scr_ref[...]            # (hb, 1, C)

    # pairwise decay  ratio[t,i] = prod_{i<j<=t} g_j  as an outer difference of
    # cumulative sums; masked exponent is <= 0 so exp never overflows, masked
    # (non-causal) entries get exponent ~ -1e30 -> exp == 0.
    neg = (mask_s[...] - 1.0) * jnp.float32(1e30)              # 0 in-mask, -1e30 out
    expo = (lc_c - lc_r) + neg[None, :, :]                     # (hb, C, C) f32
    ratio = jnp.exp(expo) * (sc_c * sc_r)                      # (hb, C, C) f32

    a_vec = jnp.exp(lc_c) * sc_c                               # decay from chunk start
    ltot = lc_c[:, C - 1:C, :]                                 # (hb, 1, 1)
    stot = sc_c[:, C - 1:C, :]
    r_vec = jnp.exp(ltot - lc_c) * (stot * sc_c)               # decay to chunk end
    a_tot = jnp.exp(ltot) * stot                               # whole-chunk decay

    kv_old = kv_state[...]                                     # (hb, d, d) f32

    # intra-chunk:  o_intra[t] = sum_{i<=t} ratio[t,i] (q_t . k_i) v_i
    s = jnp.einsum("hqd,hkd->hqk", q, k, preferred_element_type=jnp.float32)
    p = (s * ratio).astype(cdt)
    o_intra = jnp.einsum("hqk,hkd->hqd", p, v, preferred_element_type=jnp.float32)

    # inter-chunk:  o_inter[t] = A[t] * (q_t @ kv_prev)
    o_inter = a_vec * jnp.einsum("hqd,hde->hqe", q, kv_old.astype(cdt),
                                 preferred_element_type=jnp.float32)

    o_ref[...] = (o_intra + o_inter).astype(o_ref.dtype)

    # state update:  kv_new = A_tot * kv_prev + sum_i R[i] * k_i (x) v_i
    k_dec = (k.astype(jnp.float32) * r_vec).astype(cdt)
    kv_state[...] = a_tot * kv_old + jnp.einsum(
        "hkd,hke->hde", k_dec, v, preferred_element_type=jnp.float32)


# --------------------------------- wrappers ------------------------------------

def pallas_matmul(x, w, out_dtype):
    m, kdim = x.shape
    _, n = w.shape
    tm = _pick_tile(m, (512, 256, 128))
    tk = _pick_tile(kdim, (512, 256, 128))
    tn = _pick_tile(n, (256, 128))
    return pl.pallas_call(
        _matmul_kernel,
        out_shape=jax.ShapeDtypeStruct((m, n), out_dtype),
        grid_spec=pltpu.PrefetchScalarGridSpec(
            num_scalar_prefetch=0,
            grid=(m // tm, n // tn, kdim // tk),
            in_specs=[pl.BlockSpec((tm, tk), lambda i, j, kk: (i, kk)),
                      pl.BlockSpec((tk, tn), lambda i, j, kk: (kk, j))],
            out_specs=pl.BlockSpec((tm, tn), lambda i, j, kk: (i, j)),
            scratch_shapes=[pltpu.VMEM((tm, tn), jnp.float32)]),
        compiler_params=pltpu.CompilerParams(
            dimension_semantics=("parallel", "parallel", "arbitrary"),
            vmem_limit_bytes=_vmem_limit()),
    )(x, w)


def pallas_silu_gate_matmul(x, w, attn, out_dtype):
    m, kdim = x.shape
    _, n = w.shape
    tm = _pick_tile(m, (512, 256, 128))
    tk = _pick_tile(kdim, (512, 256, 128))
    tn = _pick_tile(n, (256, 128))
    return pl.pallas_call(
        _silu_gate_matmul_kernel,
        out_shape=jax.ShapeDtypeStruct((m, n), out_dtype),
        grid_spec=pltpu.PrefetchScalarGridSpec(
            num_scalar_prefetch=0,
            grid=(m // tm, n // tn, kdim // tk),
            in_specs=[pl.BlockSpec((tm, tk), lambda i, j, kk: (i, kk)),
                      pl.BlockSpec((tk, tn), lambda i, j, kk: (kk, j)),
                      pl.BlockSpec((tm, tn), lambda i, j, kk: (i, j))],
            out_specs=pl.BlockSpec((tm, tn), lambda i, j, kk: (i, j)),
            scratch_shapes=[pltpu.VMEM((tm, tn), jnp.float32)]),
        compiler_params=pltpu.CompilerParams(
            dimension_semantics=("parallel", "parallel", "arbitrary"),
            vmem_limit_bytes=_vmem_limit()),
    )(x, w, attn)


def pallas_gate_loop(q, k, v, lc_col, sc_col, lc_row, sc_row, chunk, hb, out_dtype):
    bh, n, d = q.shape
    assert n % chunk == 0 and bh % hb == 0
    qkv_spec = pl.BlockSpec((hb, chunk, d), lambda i, c: (i, c, 0))
    col_spec = pl.BlockSpec((hb, chunk, 1), lambda i, c: (i, c, 0))
    row_spec = pl.BlockSpec((hb, 1, chunk), lambda i, c: (i, 0, c))
    return pl.pallas_call(
        _gateloop_kernel,
        out_shape=jax.ShapeDtypeStruct((bh, n, d), out_dtype),
        grid_spec=pltpu.PrefetchScalarGridSpec(
            num_scalar_prefetch=0,
            grid=(bh // hb, n // chunk),
            in_specs=[qkv_spec, qkv_spec, qkv_spec,
                      col_spec, col_spec, row_spec, row_spec],
            out_specs=qkv_spec,
            scratch_shapes=[pltpu.VMEM((hb, d, d), jnp.float32),
                            pltpu.VMEM((chunk, chunk), jnp.float32)]),
        compiler_params=pltpu.CompilerParams(
            # head-block axis is independent -> parallel (megacore on v7x);
            # chunk axis carries kv_state -> arbitrary (sequential).
            dimension_semantics=("parallel", "arbitrary"),
            vmem_limit_bytes=_vmem_limit()),
    )(q, k, v, lc_col, sc_col, lc_row, sc_row)


# ---------------------------------- forward ------------------------------------

def gate_looped_attention_forward(x, params, heads,
                                  compute_dtype=jnp.float32, chunk=None):
    b, n, dim = x.shape
    w_qkv, w_a, b_a = params["w_qkv"], params["w_a"], params["b_a"]
    w_gates, w_out = params["w_gates"], params["w_out"]
    dim_inner = w_qkv.shape[0] // 3
    d = dim_inner // heads
    bh = b * heads
    m = b * n
    cdt = compute_dtype

    x2 = x.reshape(m, dim).astype(cdt)

    # ---- fused qkv + a projection: a single pass over the activations --------
    # a-columns reordered from interleaved (re, im) per head to [re... | im...].
    w_a_t = w_a.T                                                  # (dim, 2H)
    w_a_ri = jnp.concatenate([w_a_t[:, 0::2], w_a_t[:, 1::2]], axis=1)
    b_a_ri = jnp.concatenate([b_a[0::2], b_a[1::2]])               # (2H,)
    w_cat = jnp.concatenate([w_qkv.T, w_a_ri], axis=1)             # (dim, 3di+2H)
    ncols = w_cat.shape[1]
    pad_cols = (-ncols) % 128                                      # lane-dense output
    if pad_cols:
        w_cat = jnp.pad(w_cat, ((0, 0), (0, pad_cols)))

    proj = pallas_matmul(x2, w_cat.astype(cdt), out_dtype=cdt)     # (m, ncols_pad)
    qkv = proj[:, :3 * dim_inner]

    # gate nonlinearity  g = sigmoid(|a|) * Re(a)/|a|  (tiny, f32, plain XLA)
    a_ri = proj[:, 3 * dim_inner:ncols].astype(jnp.float32) + b_a_ri[None, :]
    ar, ai = a_ri[:, :heads], a_ri[:, heads:]
    mag = jnp.sqrt(ar * ar + ai * ai)
    g2d = jax.nn.sigmoid(mag) * jnp.where(mag > 0.0,
                                          ar / jnp.maximum(mag, 1e-30), 1.0)

    # ---- head split (XLA transposes in compute dtype) -------------------------
    # TODO(synk): when d % 128 == 0, fold split/merge into the gate-loop BlockSpecs.
    qkv5 = qkv.reshape(b, n, 3, heads, d)

    def to_bh(t):   # (b, n, h, d) -> (b*h, n, d)
        return t.transpose(0, 2, 1, 3).reshape(bh, n, d)

    q = to_bh(qkv5[:, :, 0])
    k = to_bh(qkv5[:, :, 1])
    v = to_bh(qkv5[:, :, 2])
    g = g2d.reshape(b, n, heads).transpose(0, 2, 1).reshape(bh, n)  # f32

    # ---- chip-aware chunking, pad sequence if it does not divide --------------
    c, n_pad = _choose_chunk(n, chunk)
    if n_pad != n:
        pw = n_pad - n
        q = jnp.pad(q, ((0, 0), (0, pw), (0, 0)))
        k = jnp.pad(k, ((0, 0), (0, pw), (0, 0)))
        v = jnp.pad(v, ((0, 0), (0, pw), (0, 0)))
        g = jnp.pad(g, ((0, 0), (0, pw)), constant_values=1.0)

    # ---- per-chunk decay statistics, hoisted out of the sequential kernel -----
    lg = jnp.log(jnp.maximum(jnp.abs(g), 1e-30))                   # <= 0
    ng = (g < 0.0).astype(jnp.float32)
    nchunks = n_pad // c
    lcum = jnp.cumsum(lg.reshape(bh, nchunks, c), axis=-1).reshape(bh, n_pad)
    ncum = jnp.cumsum(ng.reshape(bh, nchunks, c), axis=-1).reshape(bh, n_pad)
    scum = 1.0 - 2.0 * jnp.mod(ncum, 2.0)                          # parity sign +-1
    lc_col = lcum.reshape(bh, n_pad, 1)
    sc_col = scum.reshape(bh, n_pad, 1)
    lc_row = lcum.reshape(bh, 1, n_pad)
    sc_row = scum.reshape(bh, 1, n_pad)

    hb = _pick_head_block(bh, c)
    out = pallas_gate_loop(q, k, v, lc_col, sc_col, lc_row, sc_row, c, hb,
                           out_dtype=cdt)                          # (bh, n_pad, d)
    out = out[:, :n, :]

    attn = (out.reshape(b, heads, n, d)
               .transpose(0, 2, 1, 3)
               .reshape(m, dim_inner))                             # compute dtype
    # maybe_sub_ln = Identity (sub_ln=False)

    # ---- swish-gated output projection (two fully tiled kernels) --------------
    h = pallas_silu_gate_matmul(x2, w_gates.T.astype(cdt), attn, out_dtype=cdt)
    y = pallas_matmul(h, w_out.T.astype(cdt), out_dtype=jnp.float32)
    return y.reshape(b, n, dim)


# ------------------------- deterministic parameters ---------------------------

def init_params(key, dim, dim_inner, heads):
    k1, k2, k3, k4, k5 = jax.random.split(key, 5)

    def uni(k, shape, fan_in):
        bound = 1.0 / (fan_in ** 0.5)
        return jax.random.uniform(k, shape, jnp.float32, -bound, bound)

    return {
        "w_qkv": uni(k1, (3 * dim_inner, dim), dim),     # nn.Linear(dim, 3*di)
        "w_a": uni(k2, (heads * 2, dim), dim),           # nn.Linear(dim, 2*h)
        "b_a": uni(k3, (heads * 2,), dim),
        "w_gates": uni(k4, (dim_inner, dim), dim),       # nn.Linear(dim, di)
        "w_out": uni(k5, (dim, dim_inner), dim_inner),   # nn.Linear(di, dim)
    }


# ------------------------------ pure-JAX reference -----------------------------

def reference_forward(x, params, heads):
    hp = jax.lax.Precision.HIGHEST
    b, n, dim = x.shape
    w_qkv, w_a, b_a = params["w_qkv"], params["w_a"], params["b_a"]
    w_gates, w_out = params["w_gates"], params["w_out"]
    dim_inner = w_qkv.shape[0] // 3
    d = dim_inner // heads
    bh = b * heads

    qkv = jnp.einsum("bnd,ed->bne", x, w_qkv, precision=hp)
    q, k, v = jnp.split(qkv, 3, axis=-1)

    def split_heads(t):
        return t.reshape(b, n, heads, d).transpose(0, 2, 1, 3).reshape(bh, n, d)

    q, k, v = map(split_heads, (q, k, v))

    a = jnp.einsum("bnd,ed->bne", x, w_a, precision=hp) + b_a
    a = a.reshape(b, n, heads, 2).transpose(0, 2, 1, 3).reshape(bh, n, 2)
    ar, ai = a[..., 0], a[..., 1]
    mag = jnp.sqrt(ar * ar + ai * ai)
    g = jax.nn.sigmoid(mag) * jnp.where(mag > 0, ar / jnp.maximum(mag, 1e-30), 1.0)

    def step(kv, inp):
        qt, kt, vt, gt = inp
        kv = gt[:, None, None] * kv + kt[:, :, None] * vt[:, None, :]
        return kv, jnp.einsum("bd,bde->be", qt, kv, precision=hp)

    kv0 = jnp.zeros((bh, d, d), jnp.float32)
    _, out = jax.lax.scan(
        step, kv0,
        (q.transpose(1, 0, 2), k.transpose(1, 0, 2), v.transpose(1, 0, 2), g.T))
    out = out.transpose(1, 0, 2)                                   # (bh, n, d)
    out = out.reshape(b, heads, n, d).transpose(0, 2, 1, 3).reshape(b, n, dim_inner)

    gates = jax.nn.silu(jnp.einsum("bnd,ed->bne", x, w_gates, precision=hp))
    out = gates * out
    return jnp.einsum("bne,de->bnd", out, w_out, precision=hp)


# ------------------------------------ main -------------------------------------

if __name__ == "__main__":
    B, N, DIM, HEADS = 2, 8, 32, 4          # dim_inner defaults to dim
    key = jax.random.PRNGKey(0)
    kx, kp = jax.random.split(key)
    x = jax.random.normal(kx, (B, N, DIM), jnp.float32)
    params = init_params(kp, DIM, DIM, HEADS)

    y_ref = reference_forward(x, params, HEADS)

    # exact-math path: f32 MXU operands, tight tolerance
    fwd_f32 = jax.jit(functools.partial(gate_looped_attention_forward,
                                        heads=HEADS, compute_dtype=jnp.float32))
    y32 = jax.block_until_ready(fwd_f32(x, params))
    assert y32.shape == (B, N, DIM)
    err32 = float(jnp.max(jnp.abs(y32 - y_ref)))
    assert err32 < 2e-3, f"f32 max_err={err32}"

    # production path: bf16 MXU operands / intermediates, f32 accumulation,
    # f32 decay statistics and state carry
    fwd_bf16 = jax.jit(functools.partial(gate_looped_attention_forward,
                                         heads=HEADS, compute_dtype=jnp.bfloat16))
    y16 = jax.block_until_ready(fwd_bf16(x, params))
    err16 = float(jnp.max(jnp.abs(y16 - y_ref)))
    rel16 = float(jnp.linalg.norm(y16 - y_ref) / jnp.linalg.norm(y_ref))
    assert err16 < 0.25 and rel16 < 0.1, f"bf16 max_err={err16} rel_err={rel16}"

    print("KERNEL_OK")
</pallas_src>

<mosaic_0001>
module attributes {stable_mosaic.version = 11 : i64} {
  func.func @_matmul_kernel(%arg0: i32, %arg1: i32, %arg2: i32, %arg3: memref<16x32xf32, #tpu.memory_space<vmem>>, %arg4: memref<32x128xf32, #tpu.memory_space<vmem>>, %arg5: memref<16x128xf32, #tpu.memory_space<vmem>>, %arg6: memref<16x128xf32, #tpu.memory_space<vmem>>) attributes {dimension_semantics = [#tpu.dimension_semantics<parallel>, #tpu.dimension_semantics<parallel>, #tpu.dimension_semantics<arbitrary>], iteration_bounds = array<i64: 1, 1, 1>, scalar_prefetch = 0 : i64, scratch_operands = 1 : i64, tpu.core_type = #tpu.core_type<tc>, window_params = [{transform_indices = @transform_0, window_bounds = array<i64: 16, 32>}, {transform_indices = @transform_1, window_bounds = array<i64: 32, 128>}, {transform_indices = @transform_2, window_bounds = array<i64: 16, 128>}]} {
    %c0_i32 = arith.constant 0 : i32
    %0 = arith.cmpi eq, %arg2, %c0_i32 : i32
    %1 = arith.extui %0 : i1 to i32
    %c0_i32_0 = arith.constant 0 : i32
    %2 = arith.cmpi ne, %1, %c0_i32_0 : i32
    scf.if %2 {
      %cst_10 = arith.constant 0.000000e+00 : f32
      %12 = vector.broadcast %cst_10 : f32 to vector<16x128xf32>
      %c0_11 = arith.constant 0 : index
      %c0_12 = arith.constant 0 : index
      %13 = vector.load %arg6[%c0_11, %c0_12] : memref<16x128xf32, #tpu.memory_space<vmem>>, vector<16x128xf32>
      tpu.vector_store %arg6[%c0_11, %c0_12], %12 {strides = array<i32>} : memref<16x128xf32, #tpu.memory_space<vmem>>, vector<16x128xf32>,
    } else {
    }
    %c0 = arith.constant 0 : index
    %c0_1 = arith.constant 0 : index
    %3 = vector.load %arg6[%c0, %c0_1] : memref<16x128xf32, #tpu.memory_space<vmem>>, vector<16x128xf32>
    %c0_2 = arith.constant 0 : index
    %c0_3 = arith.constant 0 : index
    %4 = vector.load %arg3[%c0_2, %c0_3] : memref<16x32xf32, #tpu.memory_space<vmem>>, vector<16x32xf32>
    %c0_4 = arith.constant 0 : index
    %c0_5 = arith.constant 0 : index
    %5 = vector.load %arg4[%c0_4, %c0_5] : memref<32x128xf32, #tpu.memory_space<vmem>>, vector<32x128xf32>
    %cst = arith.constant dense<0.000000e+00> : vector<16x128xf32>
    %6 = tpu.matmul %4, %5, %cst {dimension_numbers = #tpu.dot_dimension_numbers<[1], [0], [0], [1], [0, 0, 1, 1], [], []>} : vector<16x32xf32>, vector<32x128xf32>, vector<16x128xf32> -> vector<16x128xf32>
    %7 = arith.addf %3, %6 : vector<16x128xf32>
    %c0_6 = arith.constant 0 : index
    %c0_7 = arith.constant 0 : index
    %8 = vector.load %arg6[%c0_6, %c0_7] : memref<16x128xf32, #tpu.memory_space<vmem>>, vector<16x128xf32>
    tpu.vector_store %arg6[%c0_6, %c0_7], %7 {strides = array<i32>} : memref<16x128xf32, #tpu.memory_space<vmem>>, vector<16x128xf32>,
    %c0_i32_8 = arith.constant 0 : i32
    %9 = arith.cmpi eq, %arg2, %c0_i32_8 : i32
    %10 = arith.extui %9 : i1 to i32
    %c0_i32_9 = arith.constant 0 : i32
    %11 = arith.cmpi ne, %10, %c0_i32_9 : i32
    scf.if %11 {
      %c0_10 = arith.constant 0 : index
      %c0_11 = arith.constant 0 : index
      %12 = vector.load %arg6[%c0_10, %c0_11] : memref<16x128xf32, #tpu.memory_space<vmem>>, vector<16x128xf32>
      %c0_12 = arith.constant 0 : index
      %c0_13 = arith.constant 0 : index
      %13 = vector.load %arg5[%c0_12, %c0_13] : memref<16x128xf32, #tpu.memory_space<vmem>>, vector<16x128xf32>
      tpu.vector_store %arg5[%c0_12, %c0_13], %12 {strides = array<i32>} : memref<16x128xf32, #tpu.memory_space<vmem>>, vector<16x128xf32>,
    } else {
    }
    return
  }
  func.func @transform_0(%arg0: i32, %arg1: i32, %arg2: i32) -> (i32, i32) {
    %c0_i32 = arith.constant 0 : i32
    return %arg0, %arg2 : i32, i32
  }
  func.func @transform_1(%arg0: i32, %arg1: i32, %arg2: i32) -> (i32, i32) {
    %c0_i32 = arith.constant 0 : i32
    return %arg2, %arg1 : i32, i32
  }
  func.func @transform_2(%arg0: i32, %arg1: i32, %arg2: i32) -> (i32, i32) {
    %c0_i32 = arith.constant 0 : i32
    return %arg0, %arg1 : i32, i32
  }
}

module attributes {stable_mosaic.version = 11 : i64} {
  func.func @_gateloop_kernel(%arg0: i32, %arg1: i32, %arg2: memref<8x8x8xf32, #tpu.memory_space<vmem>>, %arg3: memref<8x8x8xf32, #tpu.memory_space<vmem>>, %arg4: memref<8x8x8xf32, #tpu.memory_space<vmem>>, %arg5: memref<8x8x1xf32, #tpu.memory_space<vmem>>, %arg6: memref<8x8x1xf32, #tpu.memory_space<vmem>>, %arg7: memref<8x1x8xf32, #tpu.memory_space<vmem>>, %arg8: memref<8x1x8xf32, #tpu.memory_space<vmem>>, %arg9: memref<8x8x8xf32, #tpu.memory_space<vmem>>, %arg10: memref<8x8x8xf32, #tpu.memory_space<vmem>>, %arg11: memref<8x8xf32, #tpu.memory_space<vmem>>) attributes {dimension_semantics = [#tpu.dimension_semantics<parallel>, #tpu.dimension_semantics<arbitrary>], iteration_bounds = array<i64: 1, 1>, scalar_prefetch = 0 : i64, scratch_operands = 2 : i64, tpu.core_type = #tpu.core_type<tc>, window_params = [{transform_indices = @transform_0, window_bounds = array<i64: 8, 8, 8>}, {transform_indices = @transform_1, window_bounds = array<i64: 8, 8, 8>}, {transform_indices = @transform_2, window_bounds = array<i64: 8, 8, 8>}, {transform_indices = @transform_3, window_bounds = array<i64: 8, 8, 1>}, {transform_indices = @transform_4, window_bounds = array<i64: 8, 8, 1>}, {transform_indices = @transform_5, window_bounds = array<i64: 8, 1, 8>}, {transform_indices = @transform_6, window_bounds = array<i64: 8, 1, 8>}, {transform_indices = @transform_7, window_bounds = array<i64: 8, 8, 8>}]} {
    %c0_i32 = arith.constant 0 : i32
    %0 = arith.cmpi eq, %arg1, %c0_i32 : i32
    %1 = arith.extui %0 : i1 to i32
    %c0_i32_0 = arith.constant 0 : i32
    %2 = arith.cmpi ne, %1, %c0_i32_0 : i32
    scf.if %2 {
      %cst_37 = arith.constant 0.000000e+00 : f32
      %54 = vector.broadcast %cst_37 : f32 to vector<8x8x8xf32>
      %c0_38 = arith.constant 0 : index
      %c0_39 = arith.constant 0 : index
      %c0_40 = arith.constant 0 : index
      %55 = vector.load %arg10[%c0_38, %c0_39, %c0_40] : memref<8x8x8xf32, #tpu.memory_space<vmem>>, vector<8x8x8xf32>
      tpu.vector_store %arg10[%c0_38, %c0_39, %c0_40], %54 {strides = array<i32>} : memref<8x8x8xf32, #tpu.memory_space<vmem>>, vector<8x8x8xf32>,
      %56 = tpu.iota {dimensions = array<i32: 0>} : vector<8x8xi32>
      %57 = tpu.iota {dimensions = array<i32: 1>} : vector<8x8xi32>
      %58 = arith.cmpi sle, %57, %56 : vector<8x8xi32>
      %59 = arith.extui %58 : vector<8x8xi1> to vector<8x8xi32>
      %60 = arith.sitofp %59 : vector<8x8xi32> to vector<8x8xf32>
      %c0_41 = arith.constant 0 : index
      %c0_42 = arith.constant 0 : index
      %61 = vector.load %arg11[%c0_41, %c0_42] : memref<8x8xf32, #tpu.memory_space<vmem>>, vector<8x8xf32>
      tpu.vector_store %arg11[%c0_41, %c0_42], %60 {strides = array<i32>} : memref<8x8xf32, #tpu.memory_space<vmem>>, vector<8x8xf32>,
    } else {
    }
    %c0 = arith.constant 0 : index
    %c0_1 = arith.constant 0 : index
    %c0_2 = arith.constant 0 : index
    %3 = vector.load %arg2[%c0, %c0_1, %c0_2] : memref<8x8x8xf32, #tpu.memory_space<vmem>>, vector<8x8x8xf32>
    %c0_3 = arith.constant 0 : index
    %c0_4 = arith.constant 0 : index
    %c0_5 = arith.constant 0 : index
    %4 = vector.load %arg3[%c0_3, %c0_4, %c0_5] : memref<8x8x8xf32, #tpu.memory_space<vmem>>, vector<8x8x8xf32>
    %c0_6 = arith.constant 0 : index
    %c0_7 = arith.constant 0 : index
    %c0_8 = arith.constant 0 : index
    %5 = vector.load %arg4[%c0_6, %c0_7, %c0_8] : memref<8x8x8xf32, #tpu.memory_space<vmem>>, vector<8x8x8xf32>
    %c0_9 = arith.constant 0 : index
    %c0_10 = arith.constant 0 : index
    %c0_11 = arith.constant 0 : index
    %6 = vector.load %arg5[%c0_9, %c0_10, %c0_11] : memref<8x8x1xf32, #tpu.memory_space<vmem>>, vector<8x8x1xf32>
    %c0_12 = arith.constant 0 : index
    %c0_13 = arith.constant 0 : index
    %c0_14 = arith.constant 0 : index
    %7 = vector.load %arg6[%c0_12, %c0_13, %c0_14] : memref<8x8x1xf32, #tpu.memory_space<vmem>>, vector<8x8x1xf32>
    %c0_15 = arith.constant 0 : index
    %c0_16 = arith.constant 0 : index
    %c0_17 = arith.constant 0 : index
    %8 = vector.load %arg7[%c0_15, %c0_16, %c0_17] : memref<8x1x8xf32, #tpu.memory_space<vmem>>, vector<8x1x8xf32>
    %c0_18 = arith.constant 0 : index
    %c0_19 = arith.constant 0 : index
    %c0_20 = arith.constant 0 : index
    %9 = vector.load %arg8[%c0_18, %c0_19, %c0_20] : memref<8x1x8xf32, #tpu.memory_space<vmem>>, vector<8x1x8xf32>
    %c0_21 = arith.constant 0 : index
    %c0_22 = arith.constant 0 : index
    %10 = vector.load %arg11[%c0_21, %c0_22] : memref<8x8xf32, #tpu.memory_space<vmem>>, vector<8x8xf32>
    %cst = arith.constant 1.000000e+00 : f32
    %11 = vector.broadcast %cst : f32 to vector<8x8xf32>
    %12 = arith.subf %10, %11 : vector<8x8xf32>
    %cst_23 = arith.constant 1.000000e+30 : f32
    %13 = vector.broadcast %cst_23 : f32 to vector<8x8xf32>
    %14 = arith.mulf %12, %13 : vector<8x8xf32>
    %15 = vector.broadcast %6 : vector<8x8x1xf32> to vector<8x8x8xf32>
    %16 = vector.broadcast %8 : vector<8x1x8xf32> to vector<8x8x8xf32>
    %17 = arith.subf %15, %16 : vector<8x8x8xf32>
    %18 = vector.shape_cast %14 : vector<8x8xf32> to vector<1x8x8xf32>
    %19 = vector.broadcast %18 : vector<1x8x8xf32> to vector<8x8x8xf32>
    %20 = arith.addf %17, %19 : vector<8x8x8xf32>
    %21 = math.exp %20 : vector<8x8x8xf32>
    %22 = vector.broadcast %7 : vector<8x8x1xf32> to vector<8x8x8xf32>
    %23 = vector.broadcast %9 : vector<8x1x8xf32> to vector<8x8x8xf32>
    %24 = arith.mulf %22, %23 : vector<8x8x8xf32>
    %25 = arith.mulf %21, %24 : vector<8x8x8xf32>
    %26 = math.exp %6 : vector<8x8x1xf32>
    %27 = arith.mulf %26, %7 : vector<8x8x1xf32>
    %28 = vector.extract_strided_slice %6 {offsets = [0, 7, 0], sizes = [8, 1, 1], strides = [1, 1, 1]} : vector<8x8x1xf32> to vector<8x1x1xf32>
    %29 = vector.extract_strided_slice %7 {offsets = [0, 7, 0], sizes = [8, 1, 1], strides = [1, 1, 1]} : vector<8x8x1xf32> to vector<8x1x1xf32>
    %30 = vector.broadcast %28 : vector<8x1x1xf32> to vector<8x8x1xf32>
    %31 = arith.subf %30, %6 : vector<8x8x1xf32>
    %32 = math.exp %31 : vector<8x8x1xf32>
    %33 = vector.broadcast %29 : vector<8x1x1xf32> to vector<8x8x1xf32>
    %34 = arith.mulf %33, %7 : vector<8x8x1xf32>
    %35 = arith.mulf %32, %34 : vector<8x8x1xf32>
    %36 = math.exp %28 : vector<8x1x1xf32>
    %37 = arith.mulf %36, %29 : vector<8x1x1xf32>
    %c0_24 = arith.constant 0 : index
    %c0_25 = arith.constant 0 : index
    %c0_26 = arith.constant 0 : index
    %38 = vector.load %arg10[%c0_24, %c0_25, %c0_26] : memref<8x8x8xf32, #tpu.memory_space<vmem>>, vector<8x8x8xf32>
    "tpu.trace_start"() <{level = 10 : i32, message = "hqd,hkd->hqk"}> : () -> ()
    %cst_27 = arith.constant dense<0.000000e+00> : vector<8x8x8xf32>
    %39 = tpu.matmul %3, %4, %cst_27 {dimension_numbers = #tpu.dot_dimension_numbers<[2], [2], [1], [1], [0, 0, 0, 1, 1, 1], [0], [0]>} : vector<8x8x8xf32>, vector<8x8x8xf32>, vector<8x8x8xf32> -> vector<8x8x8xf32>
    "tpu.trace_stop"() : () -> ()
    %40 = arith.mulf %39, %25 : vector<8x8x8xf32>
    "tpu.trace_start"() <{level = 10 : i32, message = "hqk,hkd->hqd"}> : () -> ()
    %cst_28 = arith.constant dense<0.000000e+00> : vector<8x8x8xf32>
    %41 = tpu.matmul %40, %5, %cst_28 {dimension_numbers = #tpu.dot_dimension_numbers<[2], [1], [1], [2], [0, 0, 0, 1, 1, 2], [0], [0]>} : vector<8x8x8xf32>, vector<8x8x8xf32>, vector<8x8x8xf32> -> vector<8x8x8xf32>
    "tpu.trace_stop"() : () -> ()
    "tpu.trace_start"() <{level = 10 : i32, message = "hqd,hde->hqe"}> : () -> ()
    %cst_29 = arith.constant dense<0.000000e+00> : vector<8x8x8xf32>
    %42 = tpu.matmul %3, %38, %cst_29 {dimension_numbers = #tpu.dot_dimension_numbers<[2], [1], [1], [2], [0, 0, 0, 1, 1, 2], [0], [0]>} : vector<8x8x8xf32>, vector<8x8x8xf32>, vector<8x8x8xf32> -> vector<8x8x8xf32>
    "tpu.trace_stop"() : () -> ()
    %43 = vector.broadcast %27 : vector<8x8x1xf32> to vector<8x8x8xf32>
    %44 = arith.mulf %43, %42 : vector<8x8x8xf32>
    %45 = arith.addf %41, %44 : vector<8x8x8xf32>
    %c0_30 = arith.constant 0 : index
    %c0_31 = arith.constant 0 : index
    %c0_32 = arith.constant 0 : index
    %46 = vector.load %arg9[%c0_30, %c0_31, %c0_32] : memref<8x8x8xf32, #tpu.memory_space<vmem>>, vector<8x8x8xf32>
    tpu.vector_store %arg9[%c0_30, %c0_31, %c0_32], %45 {strides = array<i32>} : memref<8x8x8xf32, #tpu.memory_space<vmem>>, vector<8x8x8xf32>,
    %47 = vector.broadcast %35 : vector<8x8x1xf32> to vector<8x8x8xf32>
    %48 = arith.mulf %4, %47 : vector<8x8x8xf32>
    %49 = vector.broadcast %37 : vector<8x1x1xf32> to vector<8x8x8xf32>
    %50 = arith.mulf %49, %38 : vector<8x8x8xf32>
    "tpu.trace_start"() <{level = 10 : i32, message = "hkd,hke->hde"}> : () -> ()
    %cst_33 = arith.constant dense<0.000000e+00> : vector<8x8x8xf32>
    %51 = tpu.matmul %48, %5, %cst_33 {dimension_numbers = #tpu.dot_dimension_numbers<[1], [1], [2], [2], [0, 0, 0, 2, 1, 2], [0], [0]>} : vector<8x8x8xf32>, vector<8x8x8xf32>, vector<8x8x8xf32> -> vector<8x8x8xf32>
    "tpu.trace_stop"() : () -> ()
    %52 = arith.addf %50, %51 : vector<8x8x8xf32>
    %c0_34 = arith.constant 0 : index
    %c0_35 = arith.constant 0 : index
    %c0_36 = arith.constant 0 : index
    %53 = vector.load %arg10[%c0_34, %c0_35, %c0_36] : memref<8x8x8xf32, #tpu.memory_space<vmem>>, vector<8x8x8xf32>
    tpu.vector_store %arg10[%c0_34, %c0_35, %c0_36], %52 {strides = array<i32>} : memref<8x8x8xf32, #tpu.memory_space<vmem>>, vector<8x8x8xf32>,
    return
  }
  func.func @transform_0(%arg0: i32, %arg1: i32) -> (i32, i32, i32) {
    %c0_i32 = arith.constant 0 : i32
    %c0_i32_0 = arith.constant 0 : i32
    return %arg0, %arg1, %c0_i32 : i32, i32, i32
  }
  func.func @transform_1(%arg0: i32, %arg1: i32) -> (i32, i32, i32) {
    %c0_i32 = arith.constant 0 : i32
    %c0_i32_0 = arith.constant 0 : i32
    return %arg0, %arg1, %c0_i32 : i32, i32, i32
  }
  func.func @transform_2(%arg0: i32, %arg1: i32) -> (i32, i32, i32) {
    %c0_i32 = arith.constant 0 : i32
    %c0_i32_0 = arith.constant 0 : i32
    return %arg0, %arg1, %c0_i32 : i32, i32, i32
  }
  func.func @transform_3(%arg0: i32, %arg1: i32) -> (i32, i32, i32) {
    %c0_i32 = arith.constant 0 : i32
    %c0_i32_0 = arith.constant 0 : i32
    return %arg0, %arg1, %c0_i32 : i32, i32, i32
  }
  func.func @transform_4(%arg0: i32, %arg1: i32) -> (i32, i32, i32) {
    %c0_i32 = arith.constant 0 : i32
    %c0_i32_0 = arith.constant 0 : i32
    return %arg0, %arg1, %c0_i32 : i32, i32, i32
  }
  func.func @transform_5(%arg0: i32, %arg1: i32) -> (i32, i32, i32) {
    %c0_i32 = arith.constant 0 : i32
    %c0_i32_0 = arith.constant 0 : i32
    return %arg0, %c0_i32, %arg1 : i32, i32, i32
  }
  func.func @transform_6(%arg0: i32, %arg1: i32) -> (i32, i32, i32) {
    %c0_i32 = arith.constant 0 : i32
    %c0_i32_0 = arith.constant 0 : i32
    return %arg0, %c0_i32, %arg1 : i32, i32, i32
  }
  func.func @transform_7(%arg0: i32, %arg1: i32) -> (i32, i32, i32) {
    %c0_i32 = arith.constant 0 : i32
    %c0_i32_0 = arith.constant 0 : i32
    return %arg0, %arg1, %c0_i32 : i32, i32, i32
  }
}

module attributes {stable_mosaic.version = 11 : i64} {
  func.func @_matmul_kernel(%arg0: i32, %arg1: i32, %arg2: i32, %arg3: memref<16x32xf32, #tpu.memory_space<vmem>>, %arg4: memref<32x32xf32, #tpu.memory_space<vmem>>, %arg5: memref<16x32xf32, #tpu.memory_space<vmem>>, %arg6: memref<16x32xf32, #tpu.memory_space<vmem>>) attributes {dimension_semantics = [#tpu.dimension_semantics<parallel>, #tpu.dimension_semantics<parallel>, #tpu.dimension_semantics<arbitrary>], iteration_bounds = array<i64: 1, 1, 1>, scalar_prefetch = 0 : i64, scratch_operands = 1 : i64, tpu.core_type = #tpu.core_type<tc>, window_params = [{transform_indices = @transform_0, window_bounds = array<i64: 16, 32>}, {transform_indices = @transform_1, window_bounds = array<i64: 32, 32>}, {transform_indices = @transform_2, window_bounds = array<i64: 16, 32>}]} {
    %c0_i32 = arith.constant 0 : i32
    %0 = arith.cmpi eq, %arg2, %c0_i32 : i32
    %1 = arith.extui %0 : i1 to i32
    %c0_i32_0 = arith.constant 0 : i32
    %2 = arith.cmpi ne, %1, %c0_i32_0 : i32
    scf.if %2 {
      %cst_10 = arith.constant 0.000000e+00 : f32
      %12 = vector.broadcast %cst_10 : f32 to vector<16x32xf32>
      %c0_11 = arith.constant 0 : index
      %c0_12 = arith.constant 0 : index
      %13 = vector.load %arg6[%c0_11, %c0_12] : memref<16x32xf32, #tpu.memory_space<vmem>>, vector<16x32xf32>
      tpu.vector_store %arg6[%c0_11, %c0_12], %12 {strides = array<i32>} : memref<16x32xf32, #tpu.memory_space<vmem>>, vector<16x32xf32>,
    } else {
    }
    %c0 = arith.constant 0 : index
    %c0_1 = arith.constant 0 : index
    %3 = vector.load %arg6[%c0, %c0_1] : memref<16x32xf32, #tpu.memory_space<vmem>>, vector<16x32xf32>
    %c0_2 = arith.constant 0 : index
    %c0_3 = arith.constant 0 : index
    %4 = vector.load %arg3[%c0_2, %c0_3] : memref<16x32xf32, #tpu.memory_space<vmem>>, vector<16x32xf32>
    %c0_4 = arith.constant 0 : index
    %c0_5 = arith.constant 0 : index
    %5 = vector.load %arg4[%c0_4, %c0_5] : memref<32x32xf32, #tpu.memory_space<vmem>>, vector<32x32xf32>
    %cst = arith.constant dense<0.000000e+00> : vector<16x32xf32>
    %6 = tpu.matmul %4, %5, %cst {dimension_numbers = #tpu.dot_dimension_numbers<[1], [0], [0], [1], [0, 0, 1, 1], [], []>} : vector<16x32xf32>, vector<32x32xf32>, vector<16x32xf32> -> vector<16x32xf32>
    %7 = arith.addf %3, %6 : vector<16x32xf32>
    %c0_6 = arith.constant 0 : index
    %c0_7 = arith.constant 0 : index
    %8 = vector.load %arg6[%c0_6, %c0_7] : memref<16x32xf32, #tpu.memory_space<vmem>>, vector<16x32xf32>
    tpu.vector_store %arg6[%c0_6, %c0_7], %7 {strides = array<i32>} : memref<16x32xf32, #tpu.memory_space<vmem>>, vector<16x32xf32>,
    %c0_i32_8 = arith.constant 0 : i32
    %9 = arith.cmpi eq, %arg2, %c0_i32_8 : i32
    %10 = arith.extui %9 : i1 to i32
    %c0_i32_9 = arith.constant 0 : i32
    %11 = arith.cmpi ne, %10, %c0_i32_9 : i32
    scf.if %11 {
      %c0_10 = arith.constant 0 : index
      %c0_11 = arith.constant 0 : index
      %12 = vector.load %arg6[%c0_10, %c0_11] : memref<16x32xf32, #tpu.memory_space<vmem>>, vector<16x32xf32>
      %c0_12 = arith.constant 0 : index
      %c0_13 = arith.constant 0 : index
      %13 = vector.load %arg5[%c0_12, %c0_13] : memref<16x32xf32, #tpu.memory_space<vmem>>, vector<16x32xf32>
      tpu.vector_store %arg5[%c0_12, %c0_13], %12 {strides = array<i32>} : memref<16x32xf32, #tpu.memory_space<vmem>>, vector<16x32xf32>,
    } else {
    }
    return
  }
  func.func @transform_0(%arg0: i32, %arg1: i32, %arg2: i32) -> (i32, i32) {
    %c0_i32 = arith.constant 0 : i32
    return %arg0, %arg2 : i32, i32
  }
  func.func @transform_1(%arg0: i32, %arg1: i32, %arg2: i32) -> (i32, i32) {
    %c0_i32 = arith.constant 0 : i32
    return %arg2, %arg1 : i32, i32
  }
  func.func @transform_2(%arg0: i32, %arg1: i32, %arg2: i32) -> (i32, i32) {
    %c0_i32 = arith.constant 0 : i32
    return %arg0, %arg1 : i32, i32
  }
}

module attributes {stable_mosaic.version = 11 : i64} {
  func.func @_silu_gate_matmul_kernel(%arg0: i32, %arg1: i32, %arg2: i32, %arg3: memref<16x32xf32, #tpu.memory_space<vmem>>, %arg4: memref<32x32xf32, #tpu.memory_space<vmem>>, %arg5: memref<16x32xf32, #tpu.memory_space<vmem>>, %arg6: memref<16x32xf32, #tpu.memory_space<vmem>>, %arg7: memref<16x32xf32, #tpu.memory_space<vmem>>) attributes {dimension_semantics = [#tpu.dimension_semantics<parallel>, #tpu.dimension_semantics<parallel>, #tpu.dimension_semantics<arbitrary>], iteration_bounds = array<i64: 1, 1, 1>, scalar_prefetch = 0 : i64, scratch_operands = 1 : i64, tpu.core_type = #tpu.core_type<tc>, window_params = [{transform_indices = @transform_0, window_bounds = array<i64: 16, 32>}, {transform_indices = @transform_1, window_bounds = array<i64: 32, 32>}, {transform_indices = @transform_2, window_bounds = array<i64: 16, 32>}, {transform_indices = @transform_3, window_bounds = array<i64: 16, 32>}]} {
    %c0_i32 = arith.constant 0 : i32
    %0 = arith.cmpi eq, %arg2, %c0_i32 : i32
    %1 = arith.extui %0 : i1 to i32
    %c0_i32_0 = arith.constant 0 : i32
    %2 = arith.cmpi ne, %1, %c0_i32_0 : i32
    scf.if %2 {
      %cst_10 = arith.constant 0.000000e+00 : f32
      %12 = vector.broadcast %cst_10 : f32 to vector<16x32xf32>
      %c0_11 = arith.constant 0 : index
      %c0_12 = arith.constant 0 : index
      %13 = vector.load %arg7[%c0_11, %c0_12] : memref<16x32xf32, #tpu.memory_space<vmem>>, vector<16x32xf32>
      tpu.vector_store %arg7[%c0_11, %c0_12], %12 {strides = array<i32>} : memref<16x32xf32, #tpu.memory_space<vmem>>, vector<16x32xf32>,
    } else {
    }
    %c0 = arith.constant 0 : index
    %c0_1 = arith.constant 0 : index
    %3 = vector.load %arg7[%c0, %c0_1] : memref<16x32xf32, #tpu.memory_space<vmem>>, vector<16x32xf32>
    %c0_2 = arith.constant 0 : index
    %c0_3 = arith.constant 0 : index
    %4 = vector.load %arg3[%c0_2, %c0_3] : memref<16x32xf32, #tpu.memory_space<vmem>>, vector<16x32xf32>
    %c0_4 = arith.constant 0 : index
    %c0_5 = arith.constant 0 : index
    %5 = vector.load %arg4[%c0_4, %c0_5] : memref<32x32xf32, #tpu.memory_space<vmem>>, vector<32x32xf32>
    %cst = arith.constant dense<0.000000e+00> : vector<16x32xf32>
    %6 = tpu.matmul %4, %5, %cst {dimension_numbers = #tpu.dot_dimension_numbers<[1], [0], [0], [1], [0, 0, 1, 1], [], []>} : vector<16x32xf32>, vector<32x32xf32>, vector<16x32xf32> -> vector<16x32xf32>
    %7 = arith.addf %3, %6 : vector<16x32xf32>
    %c0_6 = arith.constant 0 : index
    %c0_7 = arith.constant 0 : index
    %8 = vector.load %arg7[%c0_6, %c0_7] : memref<16x32xf32, #tpu.memory_space<vmem>>, vector<16x32xf32>
    tpu.vector_store %arg7[%c0_6, %c0_7], %7 {strides = array<i32>} : memref<16x32xf32, #tpu.memory_space<vmem>>, vector<16x32xf32>,
    %c0_i32_8 = arith.constant 0 : i32
    %9 = arith.cmpi eq, %arg2, %c0_i32_8 : i32
    %10 = arith.extui %9 : i1 to i32
    %c0_i32_9 = arith.constant 0 : i32
    %11 = arith.cmpi ne, %10, %c0_i32_9 : i32
    scf.if %11 {
      %c0_10 = arith.constant 0 : index
      %c0_11 = arith.constant 0 : index
      %12 = vector.load %arg7[%c0_10, %c0_11] : memref<16x32xf32, #tpu.memory_space<vmem>>, vector<16x32xf32>
      %13 = arith.negf %12 : vector<16x32xf32>
      %14 = math.exp %13 : vector<16x32xf32>
      %cst_12 = arith.constant 1.000000e+00 : f32
      %15 = vector.broadcast %cst_12 : f32 to vector<16x32xf32>
      %16 = arith.addf %15, %14 : vector<16x32xf32>
      %17 = arith.divf %15, %16 : vector<16x32xf32>
      %18 = arith.mulf %12, %17 : vector<16x32xf32>
      %c0_13 = arith.constant 0 : index
      %c0_14 = arith.constant 0 : index
      %19 = vector.load %arg5[%c0_13, %c0_14] : memref<16x32xf32, #tpu.memory_space<vmem>>, vector<16x32xf32>
      %20 = arith.mulf %18, %19 : vector<16x32xf32>
      %c0_15 = arith.constant 0 : index
      %c0_16 = arith.constant 0 : index
      %21 = vector.load %arg6[%c0_15, %c0_16] : memref<16x32xf32, #tpu.memory_space<vmem>>, vector<16x32xf32>
      tpu.vector_store %arg6[%c0_15, %c0_16], %20 {strides = array<i32>} : memref<16x32xf32, #tpu.memory_space<vmem>>, vector<16x32xf32>,
    } else {
    }
    return
  }
  func.func @transform_0(%arg0: i32, %arg1: i32, %arg2: i32) -> (i32, i32) {
    %c0_i32 = arith.constant 0 : i32
    return %arg0, %arg2 : i32, i32
  }
  func.func @transform_1(%arg0: i32, %arg1: i32, %arg2: i32) -> (i32, i32) {
    %c0_i32 = arith.constant 0 : i32
    return %arg2, %arg1 : i32, i32
  }
  func.func @transform_2(%arg0: i32, %arg1: i32, %arg2: i32) -> (i32, i32) {
    %c0_i32 = arith.constant 0 : i32
    return %arg0, %arg1 : i32, i32
  }
  func.func @transform_3(%arg0: i32, %arg1: i32, %arg2: i32) -> (i32, i32) {
    %c0_i32 = arith.constant 0 : i32
    return %arg0, %arg1 : i32, i32
  }
}

</mosaic_0001>

<bundles_post_ra>
// kernel: gate_looped_attention_forward.4
= control target key start
LH: loop header
LB: loop body
LE: loop exit
PB: predicated region body
PF: predicated region fallthrough
CT: control target
= control target key end

     0   :  { %vm25_vm0 = vcmask 261120   ;;  %s188_s1 = inlined_call_operand.vmem [shape: f32[32,128], index: 1, kind: input, shape index: {}]   ;;  %s189_s0 = inlined_call_operand.vmem [shape: f32[16,32], index: 0, kind: input, shape index: {}]   ;;  %s190_s2 = inlined_call_operand.vmem [shape: f32[16,128], index: 2, kind: output, shape index: {}]  }
   0x1   :  { %v21_v0 = vld [vmem:[%s188_s1] sm:$0xff]  ;;  %v22_v1 = vld [vmem:[%s188_s1 + $0x8] sm:$0xff]  ;;  %v23_v2 = vld [vmem:[%s188_s1 + $0x10] sm:$0xff] }
   0x2   :  { %v141_v3 = vpack.c.bf16 %v22_v1, %v21_v0  ;;  %v24_v4 = vld [vmem:[%s188_s1 + $0x18] sm:$0xff]  ;;  %v19_v5 = vld [vmem:[%s189_s0] sm:$0xff]  ;;  %v20_v7 = vld [vmem:[%s189_s0 + $0x8] sm:$0xff] }
   0x3   :  { %v145_v6 = vpack.c.bf16 %v24_v4, %v23_v2  ;;  %138 = vmatprep.mubr.msk.f32.mxu0 %vm25_vm0, %v19_v5 }
   0x4   :  { %142 = vmatprep.subr.bf16.mxu0 %v141_v3 }
   0x5   :  { %144 = vmatpush3.bf16.msra.mxu0 %v141_v3 }
   0x6   :  { %146 = vmatprep.subr.bf16.mxu0 %v145_v6 }
   0x9   :  { %148 = vmatpush3.bf16.msra.mxu0 %v145_v6 }
   0xc   :  { %139 = vmatmul.mubr.msk.f32.vlgmr.msra.gmra.mrb[0].mxu0 %vm25_vm0, %v20_v7 }
  0xdf   :  { %v140_v8 = vpop.f32.mrb[0].mxu0 }
  0xe0   :  { %117 = vst [vmem:[%s190_s2 + $0x8] sm:$0xff] %v140_v8  ;;  %v98_v9 = vpop.f32.mrb[1].mxu0 }
  0xe1   :  { %116 = vst [vmem:[%s190_s2] sm:$0xff] %v98_v9 }

// kernel: gate_looped_attention_forward.7
= control target key start
LH: loop header
LB: loop body
LE: loop exit
PB: predicated region body
PF: predicated region fallthrough
CT: control target
= control target key end

     0   :  { %vm16_vm0 = vcmask 261120   ;;  %v191_v6 = vmov 0.0   ;;  %s248_s0 = inlined_call_operand.vmem [shape: f32[16,32], index: 0, kind: input, shape index: {}]   ;;  %s249_s1 = inlined_call_operand.vmem [shape: f32[32,32], index: 1, kind: input, shape index: {}]   ;;  %s250_s2 = inlined_call_operand.hbm [shape: f32[16,32], index: 2, kind: output, shape index: {}]  }
   0x1   :  { %v23_v0 = vld [vmem:[%s249_s1] sm:$0xff]  ;;  %v24_v1 = vld [vmem:[%s249_s1 + $0x8] sm:$0xff]  ;;  %v25_v2 = vld [vmem:[%s249_s1 + $0x10] sm:$0xff]  ;;  %18 = vst.msk [vmem:[#allocation2 + $0x8] sm:$0xff] %vm16_vm0, %v191_v6 }
   0x2   :  { %v155_v3 = vpack.c.bf16 %v24_v1, %v23_v0  ;;  %v26_v4 = vld [vmem:[%s249_s1 + $0x18] sm:$0xff]  ;;  %v21_v5 = vld [vmem:[%s248_s0] sm:$0xff]  ;;  %17 = vst.msk [vmem:[#allocation2] sm:$0xff] %vm16_vm0, %v191_v6 }
   0x3   :  { %v159_v7 = vpack.c.bf16 %v26_v4, %v25_v2  ;;  %152 = vmatprep.mubr.msk.f32.mxu0 %vm16_vm0, %v21_v5 }
   0x4   :  { %7 = vsyncpa [#allocation4], 0  ;;  %156 = vmatprep.subr.bf16.mxu0 %v155_v3  ;;  %v22_v8 = vld [vmem:[%s248_s0 + $0x8] sm:$0xff]  ;;  %s192_s1 = smov [#allocation3]  }
   0x5   :  { %158 = vmatpush3.bf16.msra.mxu0 %v155_v3  ;;  %s125_s21 = sshll.u32 %s192_s1, 4  ;;  %s126_s21 = int_to_ptr.vmem [resolvable:$true] %s125_s21 }
   0x6   :  { %160 = vmatprep.subr.bf16.mxu0 %v159_v7  ;;  %s167_s0 = scalar_lea.vmem %s126_s21, 256  ;;  %p172_p1 = scmp.lt.s32.totalorder %s126_s21, %s126_s21 }
   0x7   :  { %p168_p0 = scmp.ne.s32.totalorder %s126_s21, %s167_s0  ;;  %p173_p2 = scmp.lt.s32.totalorder %s167_s0, %s167_s0 }
   0x8   :  { %v20_v9 = vld [vmem:[#allocation2 + $0x8] sm:$0xff] }
   0x9   :  { %162 = vmatpush3.bf16.msra.mxu0 %v159_v7  ;;  %v19_v10 = vld [vmem:[#allocation2] sm:$0xff]  ;;  %p174_p3 = por %p173_p2, %p172_p1 }
   0xb   :  { %p175_p4 = pnand %p174_p3, %p168_p0 }
   0xc   :  { %153 = vmatmul.mubr.msk.f32.vlgmr.msra.gmra.mrb[0].mxu0 %vm16_vm0, %v22_v8 }
  0xdf   :  { %v154_v11 = vpop.f32.mrb[0].mxu0 }
  0xe0   :  { %v110_v12 = vadd.f32 %v154_v11, %v20_v9  ;;  %v100_v13 = vpop.f32.mrb[1].mxu0 }
  0xe1   :  { %v109_v14 = vadd.f32 %v100_v13, %v19_v10 }
  0xe2   :  { %112 = vst.msk [vmem:[#allocation2 + $0x8] sm:$0xff] %vm16_vm0, %v110_v12 }
  0xe3   :  { %111 = vst.msk [vmem:[#allocation2] sm:$0xff] %vm16_vm0, %v109_v14 }
  0xe9   :  { %v117_v15 = vld [vmem:[#allocation2 + $0x8] sm:$0xff] }
  0xea   :  { %v116_v16 = vld [vmem:[#allocation2] sm:$0xff]  ;;  %119 = vst.msk [vmem:[#allocation3 + $0x8] sm:$0xff] %vm16_vm0, %v117_v15 }
  0xeb   :  { %118 = vst.msk [vmem:[#allocation3] sm:$0xff] %vm16_vm0, %v116_v16 }
  0xec   :  { %178 = shalt.err (!%p175_p4)
}
  0xed   :  { %s179_s24 = scalar_lea.hbm %s250_s2, 256 }
  0xee   :  { %p180_p5 = scmp.ne.s32.totalorder %s250_s2, %s179_s24  ;;  %p183_p6 = scmp.lt.u32.totalorder %s179_s24, %s250_s2 }
  0xf0   :  { %p185_p7 = pnand %p183_p6, %p180_p5 }
  0xf2   :  { %188 = shalt.err (!%p185_p7)
}
  0xf3   :  { %s193_s29 = smov 128   ;;  %s194_s30 = smov 8  }
  0xf4   :  { %131 = dma.vmem_to_hbm [thread:$0]  %s126_s21, 256, %s250_s2, [#allocation4], %s193_s29, %s193_s29, %s194_s30  }
  0xf5   :  { %189 = dma.done.wait [#allocation4], 256  }
  0xf6   :  { %190 = vsyncadd [#allocation4], 4294967040 }
  0xf7   :  { %135 = vsyncpa [#allocation4], 1 }

// kernel: gate_looped_attention_forward.6
= control target key start
LH: loop header
LB: loop body
LE: loop exit
PB: predicated region body
PF: predicated region fallthrough
CT: control target
= control target key end

     0   :  { %vm18_vm0 = vcmask 261120   ;;  %v182_v3 = vmov 0.0   ;;  %s241_s1 = inlined_call_operand.vmem [shape: f32[32,32], index: 1, kind: input, shape index: {}]   ;;  %s242_s0 = inlined_call_operand.vmem [shape: f32[16,32], index: 0, kind: input, shape index: {}]   ;;  %s243_s2 = inlined_call_operand.vmem [shape: f32[16,32], index: 2, kind: input, shape index: {}]   ;;  %s244_s3 = inlined_call_operand.vmem [shape: f32[16,32], index: 3, kind: output, shape index: {}]  }
   0x1   :  { %v25_v0 = vld [vmem:[%s241_s1] sm:$0xff]  ;;  %v26_v1 = vld [vmem:[%s241_s1 + $0x8] sm:$0xff]  ;;  %v27_v2 = vld [vmem:[%s241_s1 + $0x10] sm:$0xff]  ;;  %20 = vst.msk [vmem:[#allocation2 + $0x8] sm:$0xff] %vm18_vm0, %v182_v3 }
   0x2   :  { %19 = vst.msk [vmem:[#allocation2] sm:$0xff] %vm18_vm0, %v182_v3  ;;  %v165_v4 = vpack.c.bf16 %v26_v1, %v25_v0  ;;  %v28_v5 = vld [vmem:[%s241_s1 + $0x18] sm:$0xff]  ;;  %v23_v6 = vld [vmem:[%s242_s0] sm:$0xff]  ;;  %v24_v8 = vld [vmem:[%s242_s0 + $0x8] sm:$0xff] }
   0x3   :  { %v169_v7 = vpack.c.bf16 %v28_v5, %v27_v2  ;;  %162 = vmatprep.mubr.msk.f32.mxu0 %vm18_vm0, %v23_v6  ;;  %v135_v24 = vld [vmem:[%s243_s2 + $0x8] sm:$0xff]  ;;  %v134_v27 = vld [vmem:[%s243_s2] sm:$0xff] }
   0x4   :  { %166 = vmatprep.subr.bf16.mxu0 %v165_v4 }
   0x5   :  { %168 = vmatpush3.bf16.msra.mxu0 %v165_v4 }
   0x6   :  { %170 = vmatprep.subr.bf16.mxu0 %v169_v7 }
   0x8   :  { %v22_v9 = vld [vmem:[#allocation2 + $0x8] sm:$0xff] }
   0x9   :  { %172 = vmatpush3.bf16.msra.mxu0 %v169_v7  ;;  %v21_v10 = vld [vmem:[#allocation2] sm:$0xff] }
   0xc   :  { %163 = vmatmul.mubr.msk.f32.vlgmr.msra.gmra.mrb[0].mxu0 %vm18_vm0, %v24_v8 }
  0xdf   :  { %v164_v11 = vpop.f32.mrb[0].mxu0 }
  0xe0   :  { %v112_v12 = vadd.f32 %v164_v11, %v22_v9  ;;  %v102_v13 = vpop.f32.mrb[1].mxu0 }
  0xe1   :  { %v111_v14 = vadd.f32 %v102_v13, %v21_v10 }
  0xe2   :  { %114 = vst.msk [vmem:[#allocation2 + $0x8] sm:$0xff] %vm18_vm0, %v112_v12 }
  0xe3   :  { %113 = vst.msk [vmem:[#allocation2] sm:$0xff] %vm18_vm0, %v111_v14 }
  0xe9   :  { %v119_v15 = vld [vmem:[#allocation2 + $0x8] sm:$0xff] }
  0xea   :  { %v147_v16 = vmul.f32 -1.442695, %v119_v15  ;;  %v118_v17 = vld [vmem:[#allocation2] sm:$0xff] }
  0xeb   :  { %v146_v18 = vmul.f32 -1.442695, %v118_v17 }
  0xec   :  { %174 = vpow2.f32 %v147_v16 }
  0xed   :  { %176 = vpow2.f32 %v146_v18 }
  0xf6   :  { %v175_v19 = vpop.eup %174 }
  0xf7   :  { %v177_v20 = vpop.eup %176  ;;  %v127_v21 = vadd.f32 1.0, %v175_v19 }
  0xf8   :  { %v126_v22 = vadd.f32 1.0, %v177_v20 }
  0xf9   :  { %178 = vrcp.f32 %v127_v21 }
  0xfa   :  { %180 = vrcp.f32 %v126_v22 }
 0x103   :  { %v179_v23 = vpop.eup %178 }
 0x104   :  { %v181_v25 = vpop.eup %180  ;;  %v133_v26 = vmul.f32 %v179_v23, %v119_v15 }
 0x105   :  { %v132_v28 = vmul.f32 %v181_v25, %v118_v17 }
 0x106   :  { %v137_v29 = vmul.f32 %v135_v24, %v133_v26 }
 0x107   :  { %v136_v30 = vmul.f32 %v134_v27, %v132_v28 }
 0x108   :  { %139 = vst.msk [vmem:[%s244_s3 + $0x8] sm:$0xff] %vm18_vm0, %v137_v29 }
 0x109   :  { %138 = vst.msk [vmem:[%s244_s3] sm:$0xff] %vm18_vm0, %v136_v30 }

// kernel: gate_looped_attention_forward.5
= control target key start
LH: loop header
LB: loop body
LE: loop exit
PB: predicated region body
PF: predicated region fallthrough
CT: control target
= control target key end

     0   :  { %v39_v0 = vlaneseq  ;;  %vm30_vm0 = vcmask 64512   ;;  %v3582_v1 = vmov 0   ;;  %v3583_v2 = vmov 0.0   ;;  %s4305_s3 = inlined_call_operand.vmem [shape: f32[8,8,1], index: 3, kind: input, shape index: {}]   ;;  %s4306_s1 = inlined_call_operand.vmem [shape: f32[8,8,8], index: 1, kind: input, shape index: {}]   ;;  %s4307_s0 = inlined_call_operand.vmem [shape: f32[8,8,8], index: 0, kind: input, shape index: {}]   ;;  %s4308_s4 = inlined_call_operand.vmem [shape: f32[8,8,1], index: 4, kind: input, shape index: {}]   ;;  %s4309_s2 = inlined_call_operand.vmem [shape: f32[8,8,8], index: 2, kind: input, shape index: {}]   ;;  %s4310_s5 = inlined_call_operand.vmem [shape: f32[8,1,8], index: 5, kind: input, shape index: {}]   ;;  %s4311_s6 = inlined_call_operand.vmem [shape: f32[8,1,8], index: 6, kind: input, shape index: {}]   ;;  %s4312_s7 = inlined_call_operand.vmem [shape: f32[8,8,8], index: 7, kind: output, shape index: {}]  }
   0x1   :  { %3532 = vset.pattern.permute.xlu0 %v3582_v1  ;;  %3353 = vmatprep.subr.mxu0 %v3583_v2  ;;  %v3629_v3 = vld [vmem:[%s4305_s3] sm:$0xff]  ;;  %31 = vst.msk [vmem:[#allocation2] sm:$0xff] %vm30_vm0, %v3583_v2  ;;  %32 = vst.msk [vmem:[#allocation2 + $0x8] sm:$0xff] %vm30_vm0, %v3583_v2  ;;  %v3655_v5 = vld [vmem:[%s4306_s1 + $0x8] sm:$0xff]  ;;  %vm3584_vm1 = vmmov 0  }
   0x2   :  { %v3634_v4 = vld [vmem:[%s4306_s1] sm:$0xff]  ;;  %33 = vst.msk [vmem:[#allocation2 + $0x10] sm:$0xff] %vm30_vm0, %v3583_v2  ;;  %34 = vst.msk [vmem:[#allocation2 + $0x18] sm:$0xff] %vm30_vm0, %v3583_v2  ;;  %3358 = vmatprep.subr.mxu1 %v3583_v2  ;;  %v3659_v6 = vshrl.u32 %v39_v0, 7  ;;  %108 = vperm.xlu0 %3532, %v3629_v3   ;;  %v3665_v7 = vld [vmem:[%s4305_s3 + $0x18] sm:$0xff]  ;;  %v42_v37 = vand.u32 127, %v39_v0 }
   0x3   :  { %35 = vst.msk [vmem:[#allocation2 + $0x20] sm:$0xff] %vm30_vm0, %v3583_v2  ;;  %36 = vst.msk [vmem:[#allocation2 + $0x28] sm:$0xff] %vm30_vm0, %v3583_v2  ;;  %3354 = vmatpush3.xpose.msk.msra.mxu0 %vm30_vm0, %v3634_v4  ;;  %3359 = vmatpush3.xpose.msk.msra.mxu1 %vm30_vm0, %v3655_v5  ;;  %v3674_v8 = vld [vmem:[%s4307_s0] sm:$0xff]  ;;  %v3679_v9 = vld [vmem:[%s4307_s0 + $0x8] sm:$0xff] }
   0x4   :  { %37 = vst.msk [vmem:[#allocation2 + $0x30] sm:$0xff] %vm30_vm0, %v3583_v2  ;;  %38 = vst.msk [vmem:[#allocation2 + $0x38] sm:$0xff] %vm30_vm0, %v3583_v2  ;;  %v3682_v10 = vsub.s32 7, %v3659_v6  ;;  %3533 = vset.pattern.permute.xlu1 %v3582_v1  ;;  %3355 = vmatprep.mubr.msk.f32.mxu0 %vm3584_vm1, %v3583_v2  ;;  %v3692_v11 = vld [vmem:[%s4305_s3 + $0x8] sm:$0xff]  ;;  %v3697_v12 = vld [vmem:[%s4306_s1 + $0x10] sm:$0xff]  ;;  %vm43_vm2 = vcmp.le.s32.totalorder %v42_v37, %v3659_v6 }
   0x5   :  { %3360 = vmatprep.mubr.msk.f32.mxu1 %vm3584_vm1, %v3583_v2  ;;  %123 = vperm.xlu1 %3533, %v3665_v7   ;;  %v3702_v13 = vld [vmem:[%s4305_s3 + $0x10] sm:$0xff]  ;;  %v3717_v17 = vld [vmem:[%s4306_s1 + $0x18] sm:$0xff]  ;;  %v3722_v18 = vld [vmem:[%s4305_s3 + $0x28] sm:$0xff]  ;;  %v3231_v58 = vsel %vm43_vm2, 1.0, %v3583_v2 }
   0x6   :  { %v357_v14 = vrot.slane %v3629_v3, %v3682_v10  ;;  %v369_v15 = vrot.slane %v3665_v7, %v3682_v10  ;;  %3356 = vmatmul.mubr.msk.f32.vlgmr.msra.gmra.mrb[0].mxu0 %vm30_vm0, %v3674_v8  ;;  %3361 = vmatmul.mubr.msk.f32.vlgmr.msra.gmra.mrb[0].mxu1 %vm30_vm0, %v3679_v9  ;;  %v361_v16 = vrot.slane %v3692_v11, %v3682_v10  ;;  %v3739_v24 = vld [vmem:[%s4307_s0 + $0x10] sm:$0xff]  ;;  %v3748_v25 = vld [vmem:[%s4307_s0 + $0x18] sm:$0xff]  ;;  %v3754_v27 = vld [vmem:[%s4305_s3 + $0x20] sm:$0xff] }
   0x7   :  { %3363 = vmatprep.subr.mxu0 %v3583_v2  ;;  %3368 = vmatprep.subr.mxu1 %v3583_v2  ;;  %v377_v19 = vrot.slane %v3722_v18, %v3682_v10  ;;  %v365_v20 = vrot.slane %v3702_v13, %v3682_v10  ;;  %v3759_v28 = vld [vmem:[%s4305_s3 + $0x30] sm:$0xff]  ;;  %v3767_v31 = vld [vmem:[%s4306_s1 + $0x20] sm:$0xff]  ;;  %v3772_v32 = vld [vmem:[%s4305_s3 + $0x38] sm:$0xff]  ;;  %v373_v39 = vrot.slane %v3754_v27, %v3682_v10 }
   0x8   :  { %v386_v21 = vsub.f32 %v357_v14, %v3629_v3  ;;  %v389_v22 = vsub.f32 %v369_v15, %v3665_v7  ;;  %v387_v23 = vsub.f32 %v361_v16, %v3692_v11  ;;  %113 = vperm.xlu0 %3532, %v3692_v11   ;;  %3364 = vmatpush3.xpose.msk.msra.mxu0 %vm30_vm0, %v3697_v12  ;;  %v3781_v35 = vld [vmem:[%s4306_s1 + $0x28] sm:$0xff]  ;;  %v3796_v41 = vld [vmem:[%s4308_s4] sm:$0xff]  ;;  %v3828_v47 = vld [vmem:[%s4306_s1 + $0x30] sm:$0xff] }
   0x9   :  { %3369 = vmatpush3.xpose.msk.msra.mxu1 %vm30_vm0, %v3717_v17  ;;  %3365 = vmatprep.mubr.msk.f32.mxu0 %vm3584_vm1, %v3583_v2  ;;  %v388_v26 = vsub.f32 %v365_v20, %v3702_v13  ;;  %v391_v34 = vsub.f32 %v377_v19, %v3722_v18  ;;  %v385_v36 = vrot.slane %v3772_v32, %v3682_v10  ;;  %v3804_v42 = vld [vmem:[%s4307_s0 + $0x20] sm:$0xff]  ;;  %v3813_v43 = vld [vmem:[%s4307_s0 + $0x28] sm:$0xff]  ;;  %v3840_v52 = vld [vmem:[%s4306_s1 + $0x38] sm:$0xff] }
   0xa   :  { %v394_v29 = vmul.f32 1.442695, %v386_v21  ;;  %v396_v30 = vmul.f32 1.442695, %v387_v23  ;;  %3370 = vmatprep.mubr.msk.f32.mxu1 %vm3584_vm1, %v3583_v2  ;;  %133 = vperm.xlu1 %3533, %v3722_v18   ;;  %v400_v33 = vmul.f32 1.442695, %v389_v22  ;;  %v381_v40 = vrot.slane %v3759_v28, %v3682_v10 }
   0xb   :  { %3366 = vmatmul.mubr.msk.f32.vlgmr.msra.gmra.mrb[2].mxu0 %vm30_vm0, %v3739_v24  ;;  %3373 = vmatprep.subr.mxu0 %v3583_v2  ;;  %v398_v38 = vmul.f32 1.442695, %v388_v26  ;;  %v390_v44 = vsub.f32 %v373_v39, %v3754_v27  ;;  %v3820_v46 = vld [vmem:[%s4308_s4 + $0x8] sm:$0xff]  ;;  %v413_v48 = vrot.slane %v3796_v41, %v3682_v10  ;;  %v404_v49 = vmul.f32 1.442695, %v391_v34  ;;  %v3845_v53 = vld [vmem:[%s4308_s4 + $0x10] sm:$0xff] }
   0xc   :  { %3534 = vpow2.f32 %v394_v29  ;;  %3371 = vmatmul.mubr.msk.f32.vlgmr.msra.gmra.mrb[2].mxu1 %vm30_vm0, %v3748_v25  ;;  %3378 = vmatprep.subr.mxu1 %v3583_v2  ;;  %v392_v45 = vsub.f32 %v381_v40, %v3759_v28  ;;  %v393_v50 = vsub.f32 %v385_v36, %v3772_v32  ;;  %v417_v55 = vrot.slane %v3820_v46, %v3682_v10  ;;  %v3858_v56 = vld [vmem:[%s4307_s0 + $0x30] sm:$0xff]  ;;  %v3863_v57 = vld [vmem:[%s4308_s4 + $0x18] sm:$0xff]  ;;  %v3883_v62 = vld [vmem:[%s4308_s4 + $0x20] sm:$0xff] }
   0xd   :  { %118 = vperm.xlu0 %3532, %v3702_v13   ;;  %3374 = vmatpush3.xpose.msk.msra.mxu0 %vm30_vm0, %v3767_v31  ;;  %3536 = vpow2.f32 %v396_v30  ;;  %v402_v51 = vmul.f32 1.442695, %v390_v44  ;;  %v3875_v59 = vld [vmem:[%s4307_s0 + $0x38] sm:$0xff]  ;;  %v421_v60 = vrot.slane %v3845_v53, %v3682_v10  ;;  %v442_v61 = vmul.f32 %v413_v48, %v3796_v41  ;;  %46 = vst.msk [vmem:[#allocation3] sm:$0xff] %vm30_vm0, %v3231_v58  ;;  %v3889_v0 = vld [vmem:[#allocation2] sm:$0xff]  ;;  %v3897_v6 = vld [vmem:[%s4308_s4 + $0x30] sm:$0xff] }
   0xe   :  { %3379 = vmatpush3.xpose.msk.msra.mxu1 %vm30_vm0, %v3781_v35  ;;  %3375 = vmatprep.mubr.msk.f32.mxu0 %vm3584_vm1, %v3583_v2  ;;  %3538 = vpow2.f32 %v400_v33  ;;  %v406_v54 = vmul.f32 1.442695, %v392_v45  ;;  %v408_v63 = vmul.f32 1.442695, %v393_v50  ;;  %v443_v1 = vmul.f32 %v417_v55, %v3820_v46  ;;  %v3902_v15 = vld [vmem:[#allocation2 + $0x8] sm:$0xff]  ;;  %v3923_v29 = vld [vmem:[#allocation2 + $0x10] sm:$0xff] }
   0xf   :  { %3380 = vmatprep.mubr.msk.f32.mxu1 %vm3584_vm1, %v3583_v2  ;;  %143 = vperm.xlu1 %3533, %v3772_v32   ;;  %3540 = vpow2.f32 %v398_v38  ;;  %v425_v14 = vrot.slane %v3863_v57, %v3682_v10  ;;  %v429_v19 = vrot.slane %v3883_v62, %v3682_v10  ;;  %v3912_v20 = vld [vmem:[%s4308_s4 + $0x28] sm:$0xff]  ;;  %v444_v21 = vmul.f32 %v421_v60, %v3845_v53  ;;  %v3931_v37 = vld [vmem:[%s4308_s4 + $0x38] sm:$0xff]  ;;  %v3962_v55 = vld [vmem:[#allocation2 + $0x20] sm:$0xff] }
  0x10   :  { %3376 = vmatmul.mubr.msk.f32.vlgmr.msra.gmra.mrb[4].mxu0 %vm30_vm0, %v3804_v42  ;;  %3383 = vmatprep.subr.mxu0 %v3583_v2  ;;  %3542 = vpow2.f32 %v402_v51  ;;  %v437_v26 = vrot.slane %v3897_v6, %v3682_v10  ;;  %v433_v36 = vrot.slane %v3912_v20, %v3682_v10  ;;  %v3942_v44 = vld [vmem:[#allocation2 + $0x18] sm:$0xff]  ;;  %v441_v45 = vrot.slane %v3931_v37, %v3682_v10  ;;  %v3951_v50 = vld [vmem:[#allocation2 + $0x28] sm:$0xff] }
  0x11   :  { %3381 = vmatmul.mubr.msk.f32.vlgmr.msra.gmra.mrb[4].mxu1 %vm30_vm0, %v3813_v43  ;;  %3388 = vmatprep.subr.mxu1 %v3583_v2  ;;  %3544 = vpow2.f32 %v404_v49  ;;  %v445_v34 = vmul.f32 %v425_v14, %v3863_v57  ;;  %v446_v39 = vmul.f32 %v429_v19, %v3883_v62 }
  0x12   :  { %128 = vperm.xlu0 %3532, %v3754_v27   ;;  %3384 = vmatpush3.xpose.msk.msra.mxu0 %vm30_vm0, %v3828_v47  ;;  %3546 = vpow2.f32 %v406_v54  ;;  %v447_v49 = vmul.f32 %v433_v36, %v3912_v20 }
  0x13   :  { %3389 = vmatpush3.xpose.msk.msra.mxu1 %vm30_vm0, %v3840_v52  ;;  %3385 = vmatprep.mubr.msk.f32.mxu0 %vm3584_vm1, %v3583_v2  ;;  %3548 = vpow2.f32 %v408_v63 }
  0x14   :  { %3390 = vmatprep.mubr.msk.f32.mxu1 %vm3584_vm1, %v3583_v2  ;;  %3393 = vmatprep.subr.mxu0 %v3583_v2 }
  0x15   :  { %3386 = vmatmul.mubr.msk.f32.vlgmr.msra.gmra.mrb[6].mxu0 %vm30_vm0, %v3858_v56  ;;  %3398 = vmatprep.subr.mxu1 %v3583_v2 }
  0x16   :  { %v3535_v16 = vpop.eup %3534  ;;  %3391 = vmatmul.mubr.msk.f32.vlgmr.msra.gmra.mrb[6].mxu1 %vm30_vm0, %v3875_v59  ;;  %138 = vperm.xlu0 %3532, %v3759_v28  }
  0x17   :  { %v450_v22 = vmul.f32 %v3535_v16, %v442_v61  ;;  %3394 = vmatpush3.msra.mxu0 %v3889_v0  ;;  %3395 = vmatprep.mubr.msk.f32.mxu0 %vm3584_vm1, %v3583_v2  ;;  %v3537_v23 = vpop.eup %3536 }
  0x18   :  { %3399 = vmatpush3.msra.mxu1 %v3902_v15  ;;  %3400 = vmatprep.mubr.msk.f32.mxu1 %vm3584_vm1, %v3583_v2  ;;  %v3539_v30 = vpop.eup %3538  ;;  %v451_v33 = vmul.f32 %v3537_v23, %v443_v1  ;;  %v3976_v1 = vld [vmem:[#allocation2 + $0x30] sm:$0xff] }
  0x19   :  { %2285 = vperm.xlu1 %3533, %v450_v22   ;;  %3396 = vmatmul.mubr.msk.f32.vlgmr.msra.gmra.mrb[8].mxu0 %vm30_vm0, %v3674_v8  ;;  %v3541_v38 = vpop.eup %3540  ;;  %v453_v48 = vmul.f32 %v3539_v30, %v445_v34 }
  0x1a   :  { %3401 = vmatmul.mubr.msk.f32.vlgmr.msra.gmra.mrb[8].mxu1 %vm30_vm0, %v3679_v9  ;;  %3403 = vmatprep.subr.mxu0 %v3583_v2  ;;  %v452_v40 = vmul.f32 %v3541_v38, %v444_v21  ;;  %v3543_v8 = vpop.eup %3542  ;;  %v448_v9 = vmul.f32 %v437_v26, %v3897_v6 }
  0x1b   :  { %3404 = vmatpush3.msra.mxu0 %v3923_v29  ;;  %3405 = vmatprep.mubr.msk.f32.mxu0 %vm3584_vm1, %v3583_v2  ;;  %v3545_v51 = vpop.eup %3544  ;;  %v454_v54 = vmul.f32 %v3543_v8, %v446_v39 }
  0x1c   :  { %3408 = vmatprep.subr.mxu1 %v3583_v2  ;;  %3410 = vmatprep.mubr.msk.f32.mxu1 %vm3584_vm1, %v3583_v2  ;;  %v3547_v10 = vpop.eup %3546  ;;  %v455_v60 = vmul.f32 %v3545_v51, %v447_v49 }
  0x1d   :  { %2295 = vperm.xlu0 %3532, %v452_v40   ;;  %2290 = vperm.xlu1 %3533, %v451_v33   ;;  %v456_v58 = vmul.f32 %v3547_v10, %v448_v9  ;;  %v3549_v61 = vpop.eup %3548 }
  0x1e   :  { %3406 = vmatmul.mubr.msk.f32.vlgmr.msra.gmra.mrb[10].mxu0 %vm30_vm0, %v3739_v24  ;;  %3409 = vmatpush3.msra.mxu1 %v3942_v44  ;;  %v449_v24 = vmul.f32 %v441_v45, %v3931_v37 }
  0x1f   :  { %3411 = vmatmul.mubr.msk.f32.vlgmr.msra.gmra.mrb[10].mxu1 %vm30_vm0, %v3748_v25  ;;  %3418 = vmatprep.subr.mxu1 %v3583_v2  ;;  %v3971_v25 = vld [vmem:[#allocation2 + $0x38] sm:$0xff] }
  0x20   :  { %3419 = vmatpush3.msra.mxu1 %v3951_v50  ;;  %3420 = vmatprep.mubr.msk.f32.mxu1 %vm3584_vm1, %v3583_v2  ;;  %v457_v63 = vmul.f32 %v3549_v61, %v449_v24  ;;  %v340_v24 = vmul.f32 1.442695, %v3722_v18 }
  0x21   :  { %2305 = vperm.xlu0 %3532, %v454_v54   ;;  %2300 = vperm.xlu1 %3533, %v453_v48  }
  0x22   :  { %3413 = vmatprep.subr.mxu0 %v3583_v2  ;;  %3415 = vmatprep.mubr.msk.f32.mxu0 %vm3584_vm1, %v3583_v2 }
  0x23   :  { %3421 = vmatmul.mubr.msk.f32.vlgmr.msra.gmra.mrb[12].mxu1 %vm30_vm0, %v3813_v43  ;;  %3414 = vmatpush3.msra.mxu0 %v3962_v55  ;;  %v332_v43 = vmul.f32 1.442695, %v3692_v11 }
  0x24   :  { %3428 = vmatprep.subr.mxu1 %v3583_v2  ;;  %3416 = vmatmul.mubr.msk.f32.vlgmr.msra.gmra.mrb[12].mxu0 %vm30_vm0, %v3804_v42  ;;  %v334_v42 = vmul.f32 1.442695, %v3702_v13  ;;  %v4018_v13 = vld [vmem:[%s4309_s2] sm:$0xff] }
  0x25   :  { %2315 = vperm.xlu0 %3532, %v456_v58   ;;  %2310 = vperm.xlu1 %3533, %v455_v60   ;;  %3550 = vpow2.f32 %v332_v43  ;;  %v103_v58 = vld [vmem:[#allocation3] sm:$0xff] }
  0x26   :  { %3429 = vmatpush3.msra.mxu1 %v3971_v25  ;;  %3430 = vmatprep.mubr.msk.f32.mxu1 %vm3584_vm1, %v3583_v2  ;;  %3552 = vpow2.f32 %v334_v42  ;;  %v3232_v60 = vadd.f32 -1.0, %v103_v58  ;;  %v3235_v43 = vld [vmem:[%s4310_s5 + $0x2] ss:$0 sm:$0xff] }
  0x27   :  { %3431 = vmatmul.mubr.msk.f32.vlgmr.msra.gmra.mrb[14].mxu1 %vm30_vm0, %v3875_v59  ;;  %3423 = vmatprep.subr.mxu0 %v3583_v2  ;;  %v336_v59 = vmul.f32 1.442695, %v3665_v7 }
  0x28   :  { %3424 = vmatpush3.msra.mxu0 %v3976_v1  ;;  %3425 = vmatprep.mubr.msk.f32.mxu0 %vm3584_vm1, %v3583_v2  ;;  %v105_v61 = vmul.f32 1e+30, %v3232_v60 }
  0x29   :  { %228 = vperm.xlu0 %3532, %v3796_v41   ;;  %2320 = vperm.xlu1 %3533, %v457_v63   ;;  %3554 = vpow2.f32 %v336_v59 }
  0x2a   :  { %3426 = vmatmul.mubr.msk.f32.vlgmr.msra.gmra.mrb[14].mxu0 %vm30_vm0, %v3858_v56  ;;  %3433 = vmatprep.subr.mxu0 %v3583_v2 }
  0x2b   :  { %3438 = vmatprep.subr.mxu1 %v3583_v2  ;;  %3435 = vmatprep.mubr.msk.f32.mxu0 %vm3584_vm1, %v3583_v2 }
  0x2c   :  { %3440 = vmatprep.mubr.msk.f32.mxu1 %vm3584_vm1, %v3583_v2  ;;  %3434 = vmatpush3.msra.mxu0 %v4018_v13 }
  0x2d   :  { %238 = vperm.xlu0 %3532, %v3845_v53   ;;  %233 = vperm.xlu1 %3533, %v3820_v46  }
  0x2e   :  { %3443 = vmatprep.subr.mxu0 %v3583_v2 }
  0x2f   :  { %v3551_v11 = vpop.eup %3550 }
  0x30   :  { %v4006_v56 = vmul.f32 %v3551_v11, %v3820_v46  ;;  %v3553_v14 = vpop.eup %3552  ;;  %v4023_v46 = vld [vmem:[%s4309_s2 + $0x8] sm:$0xff]  ;;  %v344_v11 = vmul.f32 1.442695, %v3772_v32  ;;  %v3238_v32 = vld [vmem:[%s4310_s5 + $0x5] ss:$0 sm:$0xff] }
  0x31   :  { %248 = vperm.xlu0 %3532, %v3883_v62   ;;  %243 = vperm.xlu1 %3533, %v3863_v57   ;;  %v4010_v16 = vmul.f32 %v3553_v14, %v3845_v53  ;;  %v342_v14 = vmul.f32 1.442695, %v3759_v28 }
  0x32   :  { %3439 = vmatpush3.msra.mxu1 %v4023_v46 }
  0x33   :  { %v3555_v19 = vpop.eup %3554  ;;  %3448 = vmatprep.subr.mxu1 %v3583_v2 }
  0x34   :  { %v4013_v21 = vmul.f32 %v3555_v19, %v3863_v57 }
  0x35   :  { %258 = vperm.xlu0 %3532, %v3897_v6   ;;  %253 = vperm.xlu1 %3533, %v3912_v20  }
  0x39   :  { %263 = vperm.xlu1 %3533, %v3931_v37  }
  0x81   :  { %v109_v7 = vpop.permute.xlu0 %108 }
  0x84   :  { %v124_v57 = vpop.permute.xlu1 %123 }
  0x87   :  { %v114_v53 = vpop.permute.xlu0 %113 }
  0x89   :  { %v4029_v23 = vpop.permute.xlu1 %133 }
  0x8a   :  { %v199_v28 = vsub.f32 %v4029_v23, %v3238_v32 }
  0x8c   :  { %v119_v22 = vpop.permute.xlu0 %118  ;;  %v207_v23 = vadd.f32 %v199_v28, %v105_v61  ;;  %v3245_v28 = vld [vmem:[%s4311_s6 + $0x4] ss:$0 sm:$0xff] }
  0x8d   :  { %v196_v18 = vsub.f32 %v119_v22, %v3235_v43 }
  0x8e   :  { %v4033_v30 = vpop.permute.xlu1 %143  ;;  %v220_v60 = vmul.f32 1.442695, %v207_v23 }
  0x91   :  { %v4031_v26 = vpop.permute.xlu0 %128 }
  0x95   :  { %v4035_v33 = vpop.permute.xlu0 %138 }
  0x98   :  { %v2286_v34 = vpop.permute.xlu1 %2285 }
  0x99   :  { %v2323_v36 = vmul.f32 %v2286_v34, %v3634_v4  ;;  %v204_v34 = vadd.f32 %v196_v18, %v105_v61 }
  0x9b   :  { %2371 = vxpose.xlu0.b32.start.end [1/1] (short) (narrow) %v2323_v36, 8 }
  0x9c   :  { %v2296_v38 = vpop.permute.xlu0 %2295  ;;  %v2291_v39 = vpop.permute.xlu1 %2290 }
  0x9d   :  { %v2325_v40 = vmul.f32 %v2296_v38, %v3697_v12  ;;  %v2324_v45 = vmul.f32 %v2291_v39, %v3655_v5  ;;  %v3239_v39 = vld [vmem:[%s4310_s5 + $0x6] ss:$0 sm:$0xff] }
  0x9f   :  { %2476 = vxpose.xlu1.b32.start.end [1/1] (short) (narrow) %v2324_v45, 8  ;;  %2581 = vxpose.xlu0.b32.start.end [1/1] (short) (narrow) %v2325_v40, 8  ;;  %v214_v45 = vmul.f32 1.442695, %v204_v34 }
  0xa0   :  { %v2306_v8 = vpop.permute.xlu0 %2305  ;;  %v2301_v9 = vpop.permute.xlu1 %2300 }
  0xa1   :  { %v2326_v48 = vmul.f32 %v2301_v9, %v3717_v17  ;;  %v2327_v51 = vmul.f32 %v2306_v8, %v3767_v31  ;;  %v3233_v17 = vld [vmem:[%s4310_s5] ss:$0 sm:$0xff]  ;;  %v3234_v31 = vld [vmem:[%s4310_s5 + $0x1] ss:$0 sm:$0xff]  ;;  %v3240_v8 = vld [vmem:[%s4310_s5 + $0x7] ss:$0 sm:$0xff] }
  0xa2   :  { %v195_v63 = vsub.f32 %v114_v53, %v3234_v31 }
  0xa3   :  { %2686 = vxpose.xlu0.b32.start.end [1/1] (short) (narrow) %v2326_v48, 8 }
  0xa4   :  { %v2311_v49 = vpop.permute.xlu1 %2310  ;;  %v2316_v4 = vpop.permute.xlu0 %2315  ;;  %v203_v59 = vadd.f32 %v195_v63, %v105_v61 }
  0xa5   :  { %v2328_v54 = vmul.f32 %v2311_v49, %v3781_v35  ;;  %v2329_v12 = vmul.f32 %v2316_v4, %v3828_v47  ;;  %v330_v35 = vmul.f32 1.442695, %v3629_v3  ;;  %v194_v47 = vsub.f32 %v109_v7, %v3233_v17  ;;  %v3236_v3 = vld [vmem:[%s4310_s5 + $0x3] ss:$0 sm:$0xff]  ;;  %v3237_v7 = vld [vmem:[%s4310_s5 + $0x4] ss:$0 sm:$0xff] }
  0xa6   :  { %v197_v19 = vsub.f32 %v124_v57, %v3236_v3  ;;  %v212_v53 = vmul.f32 1.442695, %v203_v59  ;;  %v198_v22 = vsub.f32 %v4031_v26, %v3237_v7  ;;  %v201_v4 = vsub.f32 %v4033_v30, %v3240_v8 }
  0xa7   :  { %2896 = vxpose.xlu1.b32.start.end [1/1] (short) (narrow) %v2328_v54, 8  ;;  %2791 = vxpose.xlu0.b32.start.end [1/1] (short) (narrow) %v2327_v51, 8  ;;  %3556 = vpow2.f32 %v330_v35  ;;  %v202_v42 = vadd.f32 %v194_v47, %v105_v61  ;;  %v200_v51 = vsub.f32 %v4035_v33, %v3239_v39  ;;  %v3246_v39 = vld [vmem:[%s4311_s6 + $0x5] ss:$0 sm:$0xff] }
  0xa8   :  { %v2321_v10 = vpop.permute.xlu1 %2320  ;;  %3558 = vpow2.f32 %v340_v24  ;;  %v205_v36 = vadd.f32 %v197_v19, %v105_v61  ;;  %v229_v57 = vpop.permute.xlu0 %228  ;;  %v206_v26 = vadd.f32 %v198_v22, %v105_v61  ;;  %v209_v47 = vadd.f32 %v201_v4, %v105_v61  ;;  %v4115_v22 = vld [vmem:[%s4309_s2 + $0x10] sm:$0xff]  ;;  %v4141_v4 = vld [vmem:[%s4309_s2 + $0x20] sm:$0xff] }
  0xa9   :  { %v2330_v5 = vmul.f32 %v2321_v10, %v3840_v52  ;;  %v338_v52 = vmul.f32 1.442695, %v3754_v27  ;;  %v210_v27 = vmul.f32 1.442695, %v202_v42  ;;  %v3241_v10 = vld [vmem:[%s4311_s6] ss:$0 sm:$0xff]  ;;  %v208_v17 = vadd.f32 %v200_v51, %v105_v61 }
  0xaa   :  { %v216_v9 = vmul.f32 1.442695, %v205_v36  ;;  %v314_v31 = vmul.f32 %v3241_v10, %v229_v57  ;;  %v3247_v10 = vld [vmem:[%s4311_s6 + $0x6] ss:$0 sm:$0xff] }
  0xab   :  { %3106 = vxpose.xlu1.b32.start.end [1/1] (short) (narrow) %v2330_v5, 8  ;;  %3001 = vxpose.xlu0.b32.start.end [1/1] (short) (narrow) %v2329_v12, 8  ;;  %3560 = vpow2.f32 %v338_v52  ;;  %v3242_v12 = vld [vmem:[%s4311_s6 + $0x1] ss:$0 sm:$0xff]  ;;  %v222_v42 = vmul.f32 1.442695, %v208_v17 }
  0xac   :  { %3562 = vpow2.f32 %v344_v11  ;;  %v234_v48 = vpop.permute.xlu1 %233  ;;  %v239_v33 = vpop.permute.xlu0 %238  ;;  %v3244_v11 = vld [vmem:[%s4311_s6 + $0x3] ss:$0 sm:$0xff]  ;;  %v3248_v17 = vld [vmem:[%s4311_s6 + $0x7] ss:$0 sm:$0xff] }
  0xad   :  { %3564 = vpow2.f32 %v342_v14  ;;  %v315_v35 = vmul.f32 %v3242_v12, %v234_v48 }
  0xae   :  { %3566 = vpow2.f32 %v210_v27 }
  0xaf   :  { %3568 = vpow2.f32 %v212_v53 }
  0xb0   :  { %3570 = vpow2.f32 %v214_v45  ;;  %v244_v63 = vpop.permute.xlu1 %243  ;;  %v249_v61 = vpop.permute.xlu0 %248 }
  0xb1   :  { %v3557_v38 = vpop.eup %3556  ;;  %3572 = vpow2.f32 %v216_v9  ;;  %v317_v7 = vmul.f32 %v3244_v11, %v244_v63  ;;  %v318_v8 = vmul.f32 %v3245_v28, %v249_v61  ;;  %v4167_v61 = vld [vmem:[%s4309_s2 + $0x30] sm:$0xff] }
  0xb2   :  { %v3559_v40 = vpop.eup %3558  ;;  %v4080_v54 = vmul.f32 %v3557_v38, %v3796_v41  ;;  %v218_v41 = vmul.f32 1.442695, %v206_v26 }
  0xb3   :  { %v4091_v5 = vmul.f32 %v3559_v40, %v3912_v20 }
  0xb4   :  { %3574 = vpow2.f32 %v218_v41  ;;  %v254_v57 = vpop.permute.xlu1 %253  ;;  %v259_v12 = vpop.permute.xlu0 %258  ;;  %v4150_v41 = vld [vmem:[%s4309_s2 + $0x28] sm:$0xff] }
  0xb5   :  { %v3561_v49 = vpop.eup %3560  ;;  %3576 = vpow2.f32 %v220_v60  ;;  %v319_v48 = vmul.f32 %v3246_v39, %v254_v57 }
  0xb6   :  { %v3563_v58 = vpop.eup %3562  ;;  %v4094_v30 = vmul.f32 %v3561_v49, %v3883_v62  ;;  %v3243_v62 = vld [vmem:[%s4311_s6 + $0x2] ss:$0 sm:$0xff]  ;;  %3578 = vpow2.f32 %v222_v42 }
  0xb7   :  { %v3565_v24 = vpop.eup %3564  ;;  %v4099_v20 = vmul.f32 %v3563_v58, %v3931_v37  ;;  %v224_v37 = vmul.f32 1.442695, %v209_v47  ;;  %v316_v18 = vmul.f32 %v3243_v62, %v239_v33  ;;  %v320_v47 = vmul.f32 %v3247_v10, %v259_v12 }
  0xb8   :  { %v3567_v52 = vpop.eup %3566  ;;  %v4110_v27 = vmul.f32 %v3565_v24, %v3897_v6  ;;  %v4123_v6 = vld [vmem:[%s4309_s2 + $0x18] sm:$0xff] }
  0xb9   :  { %v3569_v43 = vpop.eup %3568  ;;  %v322_v3 = vmul.f32 %v3567_v52, %v314_v31  ;;  %3580 = vpow2.f32 %v224_v37  ;;  %v264_v31 = vpop.permute.xlu1 %263  ;;  %v4173_v37 = vld [vmem:[%s4309_s2 + $0x38] sm:$0xff] }
  0xba   :  { %v323_v59 = vmul.f32 %v3569_v43, %v315_v35  ;;  %v3571_v38 = vpop.eup %3570  ;;  %v321_v62 = vmul.f32 %v3248_v17, %v264_v31 }
  0xbb   :  { %v3573_v40 = vpop.eup %3572  ;;  %v324_v45 = vmul.f32 %v3571_v38, %v316_v18 }
  0xbc   :  { %v325_v26 = vmul.f32 %v3573_v40, %v317_v7 }
  0xbe   :  { %v3575_v60 = vpop.eup %3574 }
  0xbf   :  { %v3577_v35 = vpop.eup %3576  ;;  %v326_v24 = vmul.f32 %v3575_v60, %v318_v8 }
  0xc0   :  { %v327_v52 = vmul.f32 %v3577_v35, %v319_v48  ;;  %v3579_v18 = vpop.eup %3578  ;;  %v2331_v35 = vrot.slane %v4080_v54, 7 }
  0xc2   :  { %3513 = vpush %v2331_v35 }
  0xc9   :  { %1650 = vperm.xlu1 %3533, %v4006_v56  }
  0xcd   :  { %1655 = vperm.xlu1 %3533, %v4010_v16  }
  0xd1   :  { %1660 = vperm.xlu1 %3533, %v4013_v21  }
  0xd4   :  { %1645 = vperm.xlu0 %3532, %v4080_v54  }
  0xd5   :  { %1670 = vperm.xlu1 %3533, %v4091_v5  }
  0xd8   :  { %1665 = vperm.xlu0 %3532, %v4094_v30  }
  0xd9   :  { %v539_v14 = vpop.f32.mrb[0].mxu0  ;;  %v615_v19 = vpop.f32.mrb[0].mxu1  ;;  %1680 = vperm.xlu1 %3533, %v4099_v20  }
  0xda   :  { %v1075_v53 = vmul.f32 %v539_v14, %v322_v3  ;;  %v1076_v32 = vmul.f32 %v615_v19, %v323_v59  ;;  %v3357_v34 = vpop.f32.mrb[1].mxu0  ;;  %v3362_v36 = vpop.f32.mrb[1].mxu1  ;;  %v328_v19 = vmul.f32 %v3579_v18, %v320_v47  ;;  %v2333_v47 = vrot.slane %v4010_v16, 7 }
  0xdb   :  { %v3581_v14 = vpop.eup %3580 }
  0xdc   :  { %3436 = vmatmul.mubr.msk.f32.vlgmr.msra.gmra.mrb[16].mxu0 %vm30_vm0, %v1075_v53  ;;  %3441 = vmatmul.mubr.msk.f32.vlgmr.msra.gmra.mrb[16].mxu1 %vm30_vm0, %v1076_v32  ;;  %v329_v53 = vmul.f32 %v3581_v14, %v321_v62  ;;  %v2337_v62 = vrot.slane %v4110_v27, 7 }
  0xdd   :  { %1675 = vperm.xlu0 %3532, %v4110_v27   ;;  %3444 = vmatpush3.msra.mxu0 %v4115_v22 }
  0xde   :  { %v691_v9 = vpop.f32.mrb[2].mxu0  ;;  %3445 = vmatprep.mubr.msk.f32.mxu0 %vm3584_vm1, %v3583_v2  ;;  %3449 = vmatpush3.msra.mxu1 %v4123_v6 }
  0xdf   :  { %v1077_v49 = vmul.f32 %v691_v9, %v324_v45  ;;  %v767_v23 = vpop.f32.mrb[2].mxu1  ;;  %3450 = vmatprep.mubr.msk.f32.mxu1 %vm3584_vm1, %v3583_v2  ;;  %v3367_v51 = vpop.f32.mrb[3].mxu0  ;;  %3453 = vmatprep.subr.mxu0 %v3583_v2 }
  0xe0   :  { %v1078_v58 = vmul.f32 %v767_v23, %v325_v26  ;;  %v3372_v33 = vpop.f32.mrb[3].mxu1  ;;  %3458 = vmatprep.subr.mxu1 %v3583_v2 }
  0xe1   :  { %3446 = vmatmul.mubr.msk.f32.vlgmr.msra.gmra.mrb[18].mxu0 %vm30_vm0, %v1077_v49 }
  0xe2   :  { %3451 = vmatmul.mubr.msk.f32.vlgmr.msra.gmra.mrb[18].mxu1 %vm30_vm0, %v1078_v58  ;;  %3454 = vmatpush3.msra.mxu0 %v4141_v4 }
  0xe3   :  { %v843_v63 = vpop.f32.mrb[4].mxu0  ;;  %3455 = vmatprep.mubr.msk.f32.mxu0 %vm3584_vm1, %v3583_v2  ;;  %3459 = vmatpush3.msra.mxu1 %v4150_v41 }
  0xe4   :  { %v1079_v43 = vmul.f32 %v843_v63, %v326_v24  ;;  %v919_v11 = vpop.f32.mrb[4].mxu1  ;;  %3460 = vmatprep.mubr.msk.f32.mxu1 %vm3584_vm1, %v3583_v2  ;;  %v3377_v42 = vpop.f32.mrb[5].mxu0  ;;  %3463 = vmatprep.subr.mxu0 %v3583_v2  ;;  %v2332_v24 = vrot.slane %v4006_v56, 7  ;;  %v2334_v63 = vrot.slane %v4013_v21, 7 }
  0xe5   :  { %v1080_v3 = vmul.f32 %v919_v11, %v327_v52  ;;  %v3382_v59 = vpop.f32.mrb[5].mxu1  ;;  %3468 = vmatprep.subr.mxu1 %v3583_v2  ;;  %v2335_v52 = vrot.slane %v4094_v30, 7 }
  0xe6   :  { %3456 = vmatmul.mubr.msk.f32.vlgmr.msra.gmra.mrb[20].mxu0 %vm30_vm0, %v1079_v43  ;;  %3515 = vpush %v2332_v24  ;;  %v2338_v43 = vrot.slane %v4099_v20, 7 }
  0xe7   :  { %3461 = vmatmul.mubr.msk.f32.vlgmr.msra.gmra.mrb[20].mxu1 %vm30_vm0, %v1080_v3  ;;  %3464 = vmatpush3.msra.mxu0 %v4167_v61  ;;  %3517 = vpush %v2333_v47 }
  0xe8   :  { %v995_v7 = vpop.f32.mrb[6].mxu0  ;;  %3465 = vmatprep.mubr.msk.f32.mxu0 %vm3584_vm1, %v3583_v2  ;;  %3469 = vmatpush3.msra.mxu1 %v4173_v37  ;;  %3519 = vpush %v2334_v63 }
  0xe9   :  { %v1081_v32 = vmul.f32 %v995_v7, %v328_v19  ;;  %v1071_v34 = vpop.f32.mrb[6].mxu1  ;;  %3470 = vmatprep.mubr.msk.f32.mxu1 %vm3584_vm1, %v3583_v2  ;;  %v3387_v36 = vpop.f32.mrb[7].mxu0  ;;  %3473 = vmatprep.subr.mxu0 %v3583_v2  ;;  %3521 = vpush %v2335_v52 }
  0xea   :  { %v1082_v28 = vmul.f32 %v1071_v34, %v329_v53  ;;  %v3392_v57 = vpop.f32.mrb[7].mxu1  ;;  %3478 = vmatprep.subr.mxu1 %v3583_v2 }
  0xeb   :  { %3466 = vmatmul.mubr.msk.f32.vlgmr.msra.gmra.mrb[22].mxu0 %vm30_vm0, %v1081_v32 }
  0xec   :  { %3471 = vmatmul.mubr.msk.f32.vlgmr.msra.gmra.mrb[22].mxu1 %vm30_vm0, %v1082_v28  ;;  %3474 = vmatpush3.msra.mxu0 %v4018_v13  ;;  %v4188_v38 = vpop.f32.mrb[8].mxu0 }
  0xed   :  { %3475 = vmatprep.mubr.msk.f32.mxu0 %vm3584_vm1, %v3583_v2  ;;  %3479 = vmatpush3.msra.mxu1 %v4023_v46  ;;  %v4193_v39 = vpop.f32.mrb[8].mxu1  ;;  %v3397_v40 = vpop.f32.mrb[9].mxu0 }
  0xee   :  { %3483 = vmatprep.subr.mxu0 %v3583_v2  ;;  %3480 = vmatprep.mubr.msk.f32.mxu1 %vm3584_vm1, %v3583_v2  ;;  %v3402_v45 = vpop.f32.mrb[9].mxu1 }
  0xef   :  { %3488 = vmatprep.subr.mxu1 %v3583_v2 }
  0xf1   :  { %v4199_v8 = vpop.f32.mrb[10].mxu0 }
  0xf2   :  { %v4201_v13 = vpop.f32.mrb[10].mxu1  ;;  %v3407_v9 = vpop.f32.mrb[11].mxu0 }
  0xf3   :  { %v3412_v26 = vpop.f32.mrb[11].mxu1  ;;  %s3514_s20 = spop %3513 }
  0xf6   :  { %v4203_v48 = vpop.f32.mrb[12].mxu1 }
  0xf7   :  { %v4205_v46 = vpop.f32.mrb[12].mxu0  ;;  %v3422_v49 = vpop.f32.mrb[13].mxu1 }
  0xf8   :  { %v3417_v23 = vpop.f32.mrb[13].mxu0 }
  0xfa   :  { %v4207_v51 = vpop.f32.mrb[14].mxu1 }
  0xfb   :  { %v3432_v10 = vpop.f32.mrb[15].mxu1 }
  0xfd   :  { %v4209_v12 = vpop.f32.mrb[14].mxu0 }
  0xfe   :  { %v3427_v58 = vpop.f32.mrb[15].mxu0 }
 0x117   :  { %s3516_s21 = spop %3515 }
 0x118   :  { %s3518_s22 = spop %3517 }
 0x119   :  { %s3520_s23 = spop %3519 }
 0x11a   :  { %s3522_s24 = spop %3521  ;;  %v2349_v24 = vstv %s3520_s23 }
 0x11b   :  { %v2387_v33 = vpop.trf.xlu0 }
 0x11c   :  { %3476 = vmatmul.mubr.msk.f32.vlgmr.msra.gmra.mrb[24].mxu0 %vm30_vm0, %v2387_v33 }
 0x11d   :  { %3484 = vmatpush3.msra.mxu0 %v4115_v22  ;;  %3485 = vmatprep.mubr.msk.f32.mxu0 %vm3584_vm1, %v3583_v2 }
 0x11e   :  { %3493 = vmatprep.subr.mxu0 %v3583_v2 }
 0x11f   :  { %v2492_v60 = vpop.trf.xlu1  ;;  %v2597_v17 = vpop.trf.xlu0 }
 0x120   :  { %3481 = vmatmul.mubr.msk.f32.vlgmr.msra.gmra.mrb[24].mxu1 %vm30_vm0, %v2492_v60  ;;  %3486 = vmatmul.mubr.msk.f32.vlgmr.msra.gmra.mrb[26].mxu0 %vm30_vm0, %v2597_v17  ;;  %v2343_v17 = vstv %s3516_s21 }
 0x121   :  { %3489 = vmatpush3.msra.mxu1 %v4123_v6  ;;  %3490 = vmatprep.mubr.msk.f32.mxu1 %vm3584_vm1, %v3583_v2 }
 0x122   :  { %3498 = vmatprep.subr.mxu1 %v3583_v2  ;;  %3494 = vmatpush3.msra.mxu0 %v4141_v4 }
 0x123   :  { %v2702_v22 = vpop.trf.xlu0  ;;  %3495 = vmatprep.mubr.msk.f32.mxu0 %vm3584_vm1, %v3583_v2  ;;  %3503 = vmatprep.subr.mxu0 %v3583_v2 }
 0x124   :  { %3491 = vmatmul.mubr.msk.f32.vlgmr.msra.gmra.mrb[26].mxu1 %vm30_vm0, %v2702_v22  ;;  %v2346_v22 = vstv %s3518_s22 }
 0x125   :  { %3499 = vmatpush3.msra.mxu1 %v4150_v41  ;;  %3500 = vmatprep.mubr.msk.f32.mxu1 %vm3584_vm1, %v3583_v2 }
 0x126   :  { %3508 = vmatprep.subr.mxu1 %v3583_v2 }
 0x127   :  { %v2912_v6 = vpop.trf.xlu1  ;;  %v2807_v31 = vpop.trf.xlu0 }
 0x128   :  { %3496 = vmatmul.mubr.msk.f32.vlgmr.msra.gmra.mrb[28].mxu0 %vm30_vm0, %v2807_v31  ;;  %3501 = vmatmul.mubr.msk.f32.vlgmr.msra.gmra.mrb[28].mxu1 %vm30_vm0, %v2912_v6 }
 0x129   :  { %3504 = vmatpush3.msra.mxu0 %v4167_v61  ;;  %3509 = vmatpush3.msra.mxu1 %v4173_v37 }
 0x12a   :  { %3505 = vmatprep.mubr.msk.f32.mxu0 %vm3584_vm1, %v3583_v2  ;;  %3510 = vmatprep.mubr.msk.f32.mxu1 %vm3584_vm1, %v3583_v2  ;;  %v2336_v2 = vrot.slane %v4091_v5, 7 }
 0x12b   :  { %v3122_v4 = vpop.trf.xlu1  ;;  %v3017_v41 = vpop.trf.xlu0 }
 0x12c   :  { %3506 = vmatmul.mubr.msk.f32.vlgmr.msra.gmra.mrb[30].mxu0 %vm30_vm0, %v3017_v41  ;;  %3511 = vmatmul.mubr.msk.f32.vlgmr.msra.gmra.mrb[30].mxu1 %vm30_vm0, %v3122_v4  ;;  %3523 = vpush %v2336_v2  ;;  %v2364_v4 = vmul.f32 %v2343_v17, %v3902_v15  ;;  %v2365_v41 = vmul.f32 %v2346_v22, %v3923_v29 }
 0x12d   :  { %3525 = vpush %v2337_v62 }
 0x12e   :  { %3527 = vpush %v2338_v43 }
 0x148   :  { %v1651_v56 = vpop.permute.xlu1 %1650 }
 0x149   :  { %v1684_v21 = vmul.f32 %v1651_v56, %v4193_v39  ;;  %v2352_v56 = vstv %s3522_s24 }
 0x14c   :  { %v1656_v54 = vpop.permute.xlu1 %1655 }
 0x14d   :  { %v1685_v20 = vmul.f32 %v1656_v54, %v4199_v8 }
 0x150   :  { %v1661_v11 = vpop.permute.xlu1 %1660 }
 0x151   :  { %v1686_v18 = vmul.f32 %v1661_v11, %v4201_v13 }
 0x153   :  { %v1646_v16 = vpop.permute.xlu0 %1645 }
 0x154   :  { %v1683_v30 = vmul.f32 %v1646_v16, %v4188_v38  ;;  %v1671_v14 = vpop.permute.xlu1 %1670  ;;  %v2367_v16 = vmul.f32 %v2352_v56, %v3962_v55 }
 0x155   :  { %v1688_v57 = vmul.f32 %v1671_v14, %v4203_v48 }
 0x157   :  { %v1666_v37 = vpop.permute.xlu0 %1665 }
 0x158   :  { %v1687_v28 = vmul.f32 %v1666_v37, %v4205_v46  ;;  %v1681_v13 = vpop.permute.xlu1 %1680 }
 0x159   :  { %v1690_v48 = vmul.f32 %v1681_v13, %v4207_v51 }
 0x15c   :  { %v1676_v38 = vpop.permute.xlu0 %1675 }
 0x15d   :  { %v1689_v46 = vmul.f32 %v1676_v38, %v4209_v12  ;;  %v2340_v12 = vstv %s3514_s20 }
 0x15e   :  { %v2363_v51 = vmul.f32 %v2340_v12, %v3889_v0  ;;  %v2366_v0 = vmul.f32 %v2349_v24, %v3942_v44 }
 0x1af   :  { %v1760_v42 = vpop.f32.mrb[16].mxu0  ;;  %v1833_v5 = vpop.f32.mrb[16].mxu1 }
 0x1b0   :  { %v1761_v61 = vadd.f32 %v1760_v42, %v1683_v30  ;;  %v1834_v3 = vadd.f32 %v1833_v5, %v1684_v21  ;;  %v3437_v27 = vpop.f32.mrb[17].mxu0  ;;  %v3442_v59 = vpop.f32.mrb[17].mxu1 }
 0x1b2   :  { %2275 = vst.msk [vmem:[%s4312_s7] sm:$0xff] %vm30_vm0, %v1761_v61  ;;  %2276 = vst.msk [vmem:[%s4312_s7 + $0x8] sm:$0xff] %vm30_vm0, %v1834_v3 }
 0x1b4   :  { %v1906_v19 = vpop.f32.mrb[18].mxu0 }
 0x1b5   :  { %v1907_v7 = vadd.f32 %v1906_v19, %v1685_v20  ;;  %v1979_v53 = vpop.f32.mrb[18].mxu1  ;;  %v3447_v32 = vpop.f32.mrb[19].mxu0 }
 0x1b6   :  { %v1980_v34 = vadd.f32 %v1979_v53, %v1686_v18  ;;  %v3452_v36 = vpop.f32.mrb[19].mxu1 }
 0x1b7   :  { %2277 = vst.msk [vmem:[%s4312_s7 + $0x10] sm:$0xff] %vm30_vm0, %v1907_v7 }
 0x1b8   :  { %2278 = vst.msk [vmem:[%s4312_s7 + $0x18] sm:$0xff] %vm30_vm0, %v1980_v34 }
 0x1b9   :  { %v2052_v39 = vpop.f32.mrb[20].mxu0 }
 0x1ba   :  { %v2053_v40 = vadd.f32 %v2052_v39, %v1687_v28  ;;  %v2125_v45 = vpop.f32.mrb[20].mxu1  ;;  %v3457_v8 = vpop.f32.mrb[21].mxu0 }
 0x1bb   :  { %v2126_v9 = vadd.f32 %v2125_v45, %v1688_v57  ;;  %v3462_v26 = vpop.f32.mrb[21].mxu1 }
 0x1bc   :  { %2279 = vst.msk [vmem:[%s4312_s7 + $0x20] sm:$0xff] %vm30_vm0, %v2053_v40 }
 0x1bd   :  { %2280 = vst.msk [vmem:[%s4312_s7 + $0x28] sm:$0xff] %vm30_vm0, %v2126_v9 }
 0x1be   :  { %v2198_v49 = vpop.f32.mrb[22].mxu0 }
 0x1bf   :  { %v2199_v23 = vadd.f32 %v2198_v49, %v1689_v46  ;;  %v2271_v10 = vpop.f32.mrb[22].mxu1  ;;  %v3467_v58 = vpop.f32.mrb[23].mxu0 }
 0x1c0   :  { %v2272_v33 = vadd.f32 %v2271_v10, %v1690_v48  ;;  %v3472_v60 = vpop.f32.mrb[23].mxu1 }
 0x1c1   :  { %2281 = vst.msk [vmem:[%s4312_s7 + $0x30] sm:$0xff] %vm30_vm0, %v2199_v23 }
 0x1c2   :  { %2282 = vst.msk [vmem:[%s4312_s7 + $0x38] sm:$0xff] %vm30_vm0, %v2272_v33  ;;  %s3524_s7 = spop %3523 }
 0x1c3   :  { %s3526_s25 = spop %3525  ;;  %v2355_v54 = vstv %s3524_s7 }
 0x1c4   :  { %s3528_s26 = spop %3527  ;;  %v2368_v21 = vmul.f32 %v2355_v54, %v3951_v50  ;;  %v2358_v30 = vstv %s3526_s25 }
 0x1c5   :  { %v2361_v42 = vstv %s3528_s26  ;;  %v2369_v27 = vmul.f32 %v2358_v30, %v3976_v1 }
 0x1c6   :  { %v2370_v59 = vmul.f32 %v2361_v42, %v3971_v25 }
 0x1ef   :  { %v2472_v6 = vpop.f32.mrb[24].mxu0 }
 0x1f0   :  { %v3211_v31 = vadd.f32 %v2472_v6, %v2363_v51  ;;  %v3477_v35 = vpop.f32.mrb[25].mxu0 }
 0x1f2   :  { %3219 = vst.msk [vmem:[#allocation2] sm:$0xff] %vm30_vm0, %v3211_v31 }
 0x1f3   :  { %v2577_v47 = vpop.f32.mrb[24].mxu1  ;;  %v2682_v63 = vpop.f32.mrb[26].mxu0 }
 0x1f4   :  { %v3212_v52 = vadd.f32 %v2577_v47, %v2364_v4  ;;  %v3213_v2 = vadd.f32 %v2682_v63, %v2365_v41  ;;  %v3482_v62 = vpop.f32.mrb[25].mxu1  ;;  %v3487_v43 = vpop.f32.mrb[27].mxu0 }
 0x1f6   :  { %3220 = vst.msk [vmem:[#allocation2 + $0x8] sm:$0xff] %vm30_vm0, %v3212_v52  ;;  %3221 = vst.msk [vmem:[#allocation2 + $0x10] sm:$0xff] %vm30_vm0, %v3213_v2 }
 0x1f7   :  { %v2787_v15 = vpop.f32.mrb[26].mxu1 }
 0x1f8   :  { %v3214_v29 = vadd.f32 %v2787_v15, %v2366_v0  ;;  %v3492_v11 = vpop.f32.mrb[27].mxu1 }
 0x1fa   :  { %3222 = vst.msk [vmem:[#allocation2 + $0x18] sm:$0xff] %vm30_vm0, %v3214_v29 }
 0x1fb   :  { %v2892_v44 = vpop.f32.mrb[28].mxu0  ;;  %v2997_v5 = vpop.f32.mrb[28].mxu1 }
 0x1fc   :  { %v3215_v61 = vadd.f32 %v2892_v44, %v2367_v16  ;;  %v3216_v3 = vadd.f32 %v2997_v5, %v2368_v21  ;;  %v3497_v20 = vpop.f32.mrb[29].mxu0  ;;  %v3502_v37 = vpop.f32.mrb[29].mxu1 }
 0x1fe   :  { %3223 = vst.msk [vmem:[#allocation2 + $0x20] sm:$0xff] %vm30_vm0, %v3215_v61  ;;  %3224 = vst.msk [vmem:[#allocation2 + $0x28] sm:$0xff] %vm30_vm0, %v3216_v3 }
 0x1ff   :  { %v3102_v50 = vpop.f32.mrb[30].mxu0  ;;  %v3207_v55 = vpop.f32.mrb[30].mxu1 }
 0x200   :  { %v3217_v18 = vadd.f32 %v3102_v50, %v2369_v27  ;;  %v3218_v14 = vadd.f32 %v3207_v55, %v2370_v59  ;;  %v3507_v19 = vpop.f32.mrb[31].mxu0  ;;  %v3512_v7 = vpop.f32.mrb[31].mxu1 }
 0x202   :  { %3225 = vst.msk [vmem:[#allocation2 + $0x30] sm:$0xff] %vm30_vm0, %v3217_v18  ;;  %3226 = vst.msk [vmem:[#allocation2 + $0x38] sm:$0xff] %vm30_vm0, %v3218_v14 }

</bundles_post_ra>
